<compile_context>
chip_gen: v6e
topology: v6e:2x2x1
jax: 0.10.0
libtpu: 0.0.40
codegen_flags: <defaults>
</compile_context>

<pallas_src>
import jax
import jax.numpy as jnp
from jax.experimental import pallas as pl
from jax.experimental.pallas import tpu as pltpu

_LANE = 128
_TARGET_TILE_BYTES = 8 * 1024 * 1024    # ~8 MiB per tile, dtype-independent
_VMEM_LIMIT_BYTES = 40 * 1024 * 1024    # headroom for double-buffered in+out
_SMALL_FALLBACK_BYTES = 1 * 1024 * 1024  # below this, plain XLA is cheaper


def _neg_scale_kernel(lam_ref, g_ref, o_ref):
    # dx = -lambda * g.  lambda lives in SMEM (scalar prefetch).  The VPU has
    # huge slack in this mem-bound kernel, so the f32 multiply is free.
    lam = lam_ref[0]
    o_ref[...] = (g_ref[...].astype(jnp.float32) * (-lam)).astype(o_ref.dtype)


def _round_up(a, m):
    return ((a + m - 1) // m) * m


def _neg_scale(g, lam):
    """Compute -lam * g (lam: f32 scalar array), output dtype == g.dtype."""
    orig_shape = g.shape
    n = g.size
    if n == 0:
        return g

    itemsize = jnp.dtype(g.dtype).itemsize
    nbytes = n * itemsize
    lam = lam.astype(jnp.float32)

    # Remainder path (size % 128 != 0) and tiny gradients: a single fused XLA
    # elementwise op hits the same HBM roofline with zero pad/slice copies and
    # no pallas_call fixed overhead.
    if (n % _LANE != 0) or (nbytes < _SMALL_FALLBACK_BYTES):
        return ((-lam) * g.astype(jnp.float32)).astype(g.dtype)

    rows = n // _LANE
    slab = g.reshape(rows, _LANE)  # contiguous reshape: free in XLA

    # Byte-based tile cap, kept a multiple of 8 sublanes.
    cap_rows = max(8, (_TARGET_TILE_BYTES // (_LANE * itemsize)) // 8 * 8)
    # Ensure at least 2 blocks so a ("parallel",) grid can feed both v7x TCs.
    half_rows = _round_up(pl.cdiv(rows, 2), 8)
    tile_rows = min(cap_rows, half_rows)
    if tile_rows >= rows:
        tile_rows = rows  # single full-extent block (divisibility exempt)
    grid = (pl.cdiv(rows, tile_rows),)

    lam_arr = lam.reshape((1,))

    out = pl.pallas_call(
        _neg_scale_kernel,
        out_shape=jax.ShapeDtypeStruct((rows, _LANE), slab.dtype),
        grid_spec=pltpu.PrefetchScalarGridSpec(
            num_scalar_prefetch=1,  # lambda -> SMEM; no retrace on new values
            grid=grid,
            in_specs=[pl.BlockSpec((tile_rows, _LANE), lambda i, lam_ref: (i, 0))],
            out_specs=pl.BlockSpec((tile_rows, _LANE), lambda i, lam_ref: (i, 0)),
        ),
        compiler_params=pltpu.CompilerParams(
            dimension_semantics=("parallel",),      # megacore-splittable
            vmem_limit_bytes=_VMEM_LIMIT_BYTES,
        ),
        cost_estimate=pl.CostEstimate(
            flops=n, transcendentals=0, bytes_accessed=2 * n * itemsize),
        # The cotangent slab is dead after the backward pass: alias it to the
        # output to halve peak HBM footprint and drop defensive copies.
        input_output_aliases={1: 0},
    )(lam_arr, slab)

    return out.reshape(orig_shape)


@jax.custom_vjp
def _gradient_reversal(x, lam):
    del lam
    return x


def _grl_fwd(x, lam):
    return x, lam


def _grl_bwd(lam, g):
    return (_neg_scale(g, lam), jnp.zeros_like(lam))


_gradient_reversal.defvjp(_grl_fwd, _grl_bwd)


def gradient_reversal(x, lambda_):
    """Forward: identity. Backward: upstream grads multiplied by -lambda_."""
    return _gradient_reversal(x, jnp.asarray(lambda_, dtype=jnp.float32))


class GradientReversal:
    """JAX/Pallas equivalent of the PyTorch GradientReversal module."""

    def __init__(self, lambda_):
        self.lambda_ = lambda_

    def __call__(self, x):
        return gradient_reversal(x, self.lambda_)


if __name__ == "__main__":
    key = jax.random.PRNGKey(0)
    lambda_ = 0.7
    grl = GradientReversal(lambda_)

    # --- small NCHW input consistent with a conv-style feature map ---------
    x = jax.random.normal(key, (2, 4, 16, 16), dtype=jnp.float32)

    # Forward: must be the identity.
    y = jax.block_until_ready(grl(x))
    assert y.shape == x.shape and y.dtype == x.dtype
    assert jnp.allclose(y, x), "forward is not identity"

    # Backward (small: XLA fallback path): grads must be reversed & scaled.
    g = jax.block_until_ready(jax.grad(lambda a: jnp.sum(grl(a) * 2.0))(x))
    assert jnp.allclose(g, jnp.full_like(x, -lambda_ * 2.0), atol=1e-6), (
        "backward gradient reversal mismatch (small path)"
    )

    # --- remainder path (size % 128 != 0) -> XLA fallback -------------------
    xr = jax.random.normal(jax.random.PRNGKey(2), (3, 5, 7), dtype=jnp.float32)
    gr = jax.block_until_ready(jax.grad(lambda a: jnp.sum(grl(a)))(xr))
    assert jnp.allclose(gr, -lambda_ * jnp.ones_like(xr), atol=1e-6), (
        "backward mismatch on remainder path"
    )

    # --- large path: Pallas kernel, 2 parallel blocks ------------------------
    big = jax.random.normal(jax.random.PRNGKey(1), (8, 32, 64, 64), dtype=jnp.float32)
    g_big = jax.block_until_ready(jax.grad(lambda a: jnp.sum(grl(a)))(big))
    assert jnp.allclose(g_big, -lambda_ * jnp.ones_like(big), atol=1e-6), (
        "backward mismatch on large tiled path"
    )

    # --- large path with a masked partial final block (rows = 5000) ---------
    odd = jax.random.normal(jax.random.PRNGKey(3), (10, 500, 128), dtype=jnp.float32)
    g_odd = jax.block_until_ready(jax.grad(lambda a: jnp.sum(grl(a)))(odd))
    assert jnp.allclose(g_odd, -lambda_ * jnp.ones_like(odd), atol=1e-6), (
        "backward mismatch on partial-final-block path"
    )

    # --- bf16 gradients (byte-based tile sizing path) ------------------------
    bf = jax.random.normal(jax.random.PRNGKey(4), (8, 64, 64, 64), dtype=jnp.bfloat16)
    g_bf = jax.block_until_ready(jax.grad(
        lambda a: jnp.sum(grl(a).astype(jnp.float32)))(bf))
    assert g_bf.dtype == jnp.bfloat16
    assert jnp.allclose(g_bf.astype(jnp.float32),
                        -lambda_ * jnp.ones(bf.shape, jnp.float32), atol=1e-2), (
        "backward mismatch on bf16 path"
    )

    print("KERNEL_OK")
</pallas_src>

<mosaic_0001>
module attributes {stable_mosaic.version = 11 : i64} {
  func.func @_neg_scale_kernel(%arg0: i32, %arg1: memref<1xf32, #tpu.memory_space<smem>>, %arg2: memref<4096x128xf32, #tpu.memory_space<vmem>>, %arg3: memref<4096x128xf32, #tpu.memory_space<vmem>>) attributes {dimension_semantics = [#tpu.dimension_semantics<parallel>], iteration_bounds = array<i64: 2>, scalar_prefetch = 1 : i64, scratch_operands = 0 : i64, tpu.core_type = #tpu.core_type<tc>, window_params = [{transform_indices = @transform_0, window_bounds = array<i64: 4096, 128>}, {transform_indices = @transform_1, window_bounds = array<i64: 4096, 128>}]} {
    %c0 = arith.constant 0 : index
    %0 = memref.load %arg1[%c0] : memref<1xf32, #tpu.memory_space<smem>>
    %c0_0 = arith.constant 0 : index
    %c0_1 = arith.constant 0 : index
    %1 = vector.load %arg2[%c0_0, %c0_1] : memref<4096x128xf32, #tpu.memory_space<vmem>>, vector<4096x128xf32>
    %cst = arith.constant 0.000000e+00 : f32
    %2 = arith.subf %cst, %0 : f32
    %3 = vector.broadcast %2 : f32 to vector<4096x128xf32>
    %4 = arith.mulf %1, %3 : vector<4096x128xf32>
    %c0_2 = arith.constant 0 : index
    %c0_3 = arith.constant 0 : index
    %5 = vector.load %arg3[%c0_2, %c0_3] : memref<4096x128xf32, #tpu.memory_space<vmem>>, vector<4096x128xf32>
    tpu.vector_store %arg3[%c0_2, %c0_3], %4 {strides = array<i32>} : memref<4096x128xf32, #tpu.memory_space<vmem>>, vector<4096x128xf32>,
    return
  }
  func.func @transform_0(%arg0: i32, %arg1: memref<1xf32, #tpu.memory_space<smem>>) -> (i32, i32) {
    %c0_i32 = arith.constant 0 : i32
    %c0_i32_0 = arith.constant 0 : i32
    return %arg0, %c0_i32 : i32, i32
  }
  func.func @transform_1(%arg0: i32, %arg1: memref<1xf32, #tpu.memory_space<smem>>) -> (i32, i32) {
    %c0_i32 = arith.constant 0 : i32
    %c0_i32_0 = arith.constant 0 : i32
    return %arg0, %c0_i32 : i32, i32
  }
}

</mosaic_0001>

<bundles_post_ra>
// kernel: tpu_custom_call.1
= control target key start
LH: loop header
LB: loop body
LE: loop exit
PB: predicated region body
PF: predicated region fallthrough
CT: control target
= control target key end

     0   :  { %s3650_s0 = inlined_call_operand.<no memory space> [shape: f32[1], index: 0, kind: input, shape index: {}]   ;;  %s3651_s1 = inlined_call_operand.hbm [shape: f32[8192,128], index: 1, kind: input, shape index: {}, may-alias: {1,2}]   ;;  %s3652_s2 = inlined_call_operand.hbm [shape: f32[8192,128], index: 2, kind: output, shape index: {}, may-alias: {1,2}]  }
   0x1   :  { %7 = sst [smem:[#allocation3]] %s3650_s0 }
   0x2   :  { %8 = vsyncpa [#allocation5], 0 }
   0x3   :  { %10 = vsyncpa [#allocation5 + $0x1], 0 }
   0x4   :  { %11 = vsyncpa [#allocation6], 0 }
   0x5   :  { %13 = vsyncpa [#allocation6 + $0x1], 0  ;;  %s1949_s11 = smov 0   ;;  %s1951_s12 = smov 0  }
   0x6   :  { %s1953_s13 = smov 0   ;;  %s1955_s14 = smov 0  }
   0x7 LB: > { %s1970_s0 = sadd.s32 4294967295, %s1923_s14   ;;  %s1765_s15 = sadd.s32 4294967294, %s1923_s14   ;;  %s1923_s14 = sphi %s1955_s14, %s3667_s14   ;;  %s1919_s13 = sphi %s1953_s13, %s3666_s13   ;;  %s1915_s12 = sphi %s1951_s12, %s3665_s12   ;;  %s1911_s11 = sphi %s1949_s11, %s3664_s11  }
   0x8   : > { %s1974_s16 = sadd.s32 1, %s1923_s14   ;;  %s26_s17 = sadd.s32 1, %s1919_s13 }
   0x9   : > { %s23_s18 = ssub.s32 %s1923_s14, %s1974_s16  ;;  %p33_p0 = scmp.ne.s32.totalorder %s1919_s13, %s1915_s12 }
   0xa   : > { %p24_p1 = scmp.eq.s32.totalorder %s23_s18, 0  ;;  %p34_p2 = scmp.eq.s32.totalorder %s1923_s14, 0 }
   0xb   : > { %p39_p3 = scmp.ne.s32.totalorder %s1915_s12, %s1911_s11  ;;  %p40_p4 = scmp.eq.s32.totalorder %s1970_s0, 0 }
   0xc   : > { %s1986_s19 = scalar_select %p24_p1, %s1919_s13, %s26_s17  }
   0xd   : > { %p1988_p5 = por %p34_p2, %p33_p0  ;;  %p1992_p6 = por %p40_p4, %p39_p3 }
   0xe   : > { %p63_p7 = scmp.eq.s32.totalorder %s1970_s0, 1  ;;  %p69_p8 = scmp.eq.s32.totalorder %s1765_s15, 1 }
   0xf   : > { %s3656_s21 = scalar_select %p1992_p6, 1, 0 }
  0x10   : > { %p1793_p10 = scmp.lt.s32.totalorder %s1923_s14, 2  ;;  %p1999_p11 = por %p63_p7, %p33_p0 }
  0x11   : > { %p2003_p12 = por %p69_p8, %p39_p3  ;;  %s89_s24 = sand.u32 1, %s1919_s13  }
  0x12   : > { %s3657_s22 = scalar_select %p1999_p11, 1, 0 }
  0x13   : > { %s3658_s23 = scalar_select %p2003_p12, 1, 0 }
  0x14   : > { %s1779_s25 = sshll.u32 %s1923_s14, 16  ;;  %s1768_s26 = sshll.u32 %s89_s24, 12 }
  0x15   : > { %s2012_s29 = scalar_lea.hbm %s3651_s1, %s1779_s25  ;;  %s93_s30 = scalar_lea.vmem [#allocation4], %s1768_s26 }
  0x16   : > { %s100_s3 = sshll.u32 %s93_s30, 4  ;;  %p2016_p13 = pnand %p1793_p10, %p1988_p5  ;;  %s2020_s3 = int_to_ptr.vmem [resolvable:$true] %s100_s3 }
  0x17   : > { %s2022_s5 = scalar_lea.sflag [#allocation5], %s89_s24  ;;  %s1831_s6 = scalar_lea.hbm %s2012_s29, 65536 }
  0x18   : > { %p1832_p0 = scmp.ne.s32.totalorder %s2012_s29, %s1831_s6  ;;  %p1833_p1 = pneg %p2016_p13 }
  0x19   : > { %s1836_s9 = scalar_lea.hbm %s3651_s1, 131072  ;;  %p1837_p4 = scmp.lt.s32.totalorder %s2012_s29, %s3651_s1 }
  0x1a   : > { %p1834_p2 = pnand %p1833_p1, %p1832_p0  ;;  %p1838_p5 = scmp.lt.s32.totalorder %s1836_s9, %s1831_s6 }
  0x1c   : > { %p1835_p3 = pneg %p1834_p2  ;;  %p1839_p7 = por %p1838_p5, %p1837_p4 }
  0x1e   : > { %p1840_p8 = pnand %p1839_p7, %p1835_p3 }
  0x20   : > { %1843 = shalt.err (!%p1840_p8)
}
  0x21   : > { %s1844_s17 = scalar_lea.vmem %s2020_s3, 65536  ;;  %s1925_s18 = smov [#allocation4]  }
  0x22   : > { %p1845_p10 = scmp.ne.s32.totalorder %s2020_s3, %s1844_s17  ;;  %s1849_s20 = sshll.u32 %s1925_s18, 4  ;;  %s1850_s20 = int_to_ptr.vmem [resolvable:$false] %s1849_s20 }
  0x23   : > { %s1851_s24 = scalar_lea.vmem %s1850_s20, 131072  ;;  %p1852_p2 = scmp.lt.s32.totalorder %s2020_s3, %s1850_s20 }
  0x24   : > { %p1847_p9 = pnand %p1845_p10, %p1833_p1  ;;  %p1853_p12 = scmp.lt.s32.totalorder %s1851_s24, %s1844_s17 }
  0x26   : > { %p1848_p0 = pneg %p1847_p9  ;;  %p1854_p11 = por %p1853_p12, %p1852_p2 }
  0x28   : > { %p1855_p6 = pnand %p1854_p11, %p1848_p0 }
  0x2a   : > { %1858 = shalt.err (!%p1855_p6)
}
  0x2b   : > { %s1926_s25 = smov 128   ;;  %s1927_s26 = smov 8  }
  0x2c   : > { %1788 = dma.hbm_to_vmem [thread:$0]  (!%p2016_p13), %s2012_s29, 65536, %s2020_s3, %s2022_s5, %s1926_s25, %s1926_s25, %s1927_s26  }
  0x2d   : > { %p1771_p9 = scmp.ge.s32.totalorder %s1923_s14, 1  ;;  %p108_p1 = scmp.lt.s32.totalorder %s1923_s14, 3 }
  0x2f   : > { %p109_p3 = pnand %p1771_p9, %p108_p1 }
  0x30   : > { %s2046_s27 = sand.u32 (!%p109_p3), 1, %s1915_s12   ;;  %p3660_p6 = scmp.ne.s32.totalorder (!%p109_p3), %s3656_s21, 0 }
  0x31   : > { %112 = sbr.rel (%p109_p3) target bundleno = 335 (0x14f), region = 24  ;;  %s1772_s28 = sshll.u32 (!%p109_p3), %s2046_s27, 12 }
  0x32   : > { %s115_s30 = scalar_lea.sflag (!%p109_p3), [#allocation5], %s2046_s27  ;;  %s2052_s6 = scalar_lea.vmem (!%p109_p3), [#allocation4], %s1772_s28 }
  0x36   : > { %1902 = dma.done.wait (%p3660_p6), %s115_s30, 65536  }
  0x37   : > { %1904 = vsyncadd (%p3660_p6), %s115_s30, 4294901760  ;;  %s139_s29 = sld [smem:[#allocation3]]  ;;  %v140_v0 = vld [vmem:[%s2052_s6] sm:$0xff]  ;;  %v141_v1 = vld [vmem:[%s2052_s6 + $0x8] sm:$0xff]  ;;  %s2085_s21 = scalar_lea.vmem [#allocation7], %s1772_s28 }
  0x38   : > { %v142_v2 = vld [vmem:[%s2052_s6 + $0x10] sm:$0xff]  ;;  %v143_v3 = vld [vmem:[%s2052_s6 + $0x18] sm:$0xff]  ;;  %v144_v4 = vld [vmem:[%s2052_s6 + $0x20] sm:$0xff]  ;;  %s1780_s4 = sshll.u32 %s1970_s0, 16  ;;  %s1692_s5 = sshll.u32 %s2085_s21, 4  ;;  %s3597_s5 = int_to_ptr.vmem [resolvable:$true] %s1692_s5 }
  0x39   : > { %v145_v5 = vld [vmem:[%s2052_s6 + $0x28] sm:$0xff]  ;;  %v146_v7 = vld [vmem:[%s2052_s6 + $0x30] sm:$0xff]  ;;  %v147_v8 = vld [vmem:[%s2052_s6 + $0x38] sm:$0xff]  ;;  %s3595_s8 = scalar_lea.hbm %s3652_s2, %s1780_s4  ;;  %s1679_s9 = scalar_lea.sflag [#allocation6], %s2046_s27 }
  0x3a   : > { %v148_v9 = vld [vmem:[%s2052_s6 + $0x40] sm:$0xff]  ;;  %v149_v14 = vld [vmem:[%s2052_s6 + $0x48] sm:$0xff]  ;;  %v150_v15 = vld [vmem:[%s2052_s6 + $0x50] sm:$0xff]  ;;  %s1859_s10 = scalar_lea.vmem %s3597_s5, 65536  ;;  %p3661_p12 = scmp.ne.s32.totalorder %s3657_s22, 0 }
  0x3b   : > { %v151_v16 = vld [vmem:[%s2052_s6 + $0x58] sm:$0xff]  ;;  %v152_v21 = vld [vmem:[%s2052_s6 + $0x60] sm:$0xff]  ;;  %v153_v22 = vld [vmem:[%s2052_s6 + $0x68] sm:$0xff]  ;;  %p1860_p11 = scmp.ne.s32.totalorder %s3597_s5, %s1859_s10  ;;  %s1928_s15 = smov [#allocation7]  }
  0x3c   : > { %v154_v23 = vld [vmem:[%s2052_s6 + $0x70] sm:$0xff]  ;;  %v155_v28 = vld [vmem:[%s2052_s6 + $0x78] sm:$0xff]  ;;  %v156_v29 = vld [vmem:[%s2052_s6 + $0x80] sm:$0xff]  ;;  %s1863_s17 = sshll.u32 %s1928_s15, 4  ;;  %s1864_s17 = int_to_ptr.vmem [resolvable:$false] %s1863_s17 }
  0x3d   : > { %s652_s3 = ssub.f32 0.0, %s139_s29  ;;  %v157_v30 = vld [vmem:[%s2052_s6 + $0x88] sm:$0xff]  ;;  %v158_v35 = vld [vmem:[%s2052_s6 + $0x90] sm:$0xff]  ;;  %v159_v36 = vld [vmem:[%s2052_s6 + $0x98] sm:$0xff]  ;;  %p1861_p13 = pnand %p1860_p11, %p3661_p12 }
  0x3e   : > { %v160_v37 = vld [vmem:[%s2052_s6 + $0xa0] sm:$0xff]  ;;  %v161_v42 = vld [vmem:[%s2052_s6 + $0xa8] sm:$0xff]  ;;  %v162_v43 = vld [vmem:[%s2052_s6 + $0xb0] sm:$0xff]  ;;  %s1865_s18 = scalar_lea.vmem %s1864_s17, 131072  ;;  %p1866_p5 = scmp.lt.s32.totalorder %s3597_s5, %s1864_s17 }
  0x3f   : > { %v2064_v6 = vstv %s652_s3  ;;  %v163_v44 = vld [vmem:[%s2052_s6 + $0xb8] sm:$0xff]  ;;  %v164_v49 = vld [vmem:[%s2052_s6 + $0xc0] sm:$0xff]  ;;  %v165_v50 = vld [vmem:[%s2052_s6 + $0xc8] sm:$0xff]  ;;  %p1862_p4 = pneg %p1861_p13  ;;  %p1867_p7 = scmp.lt.s32.totalorder %s1865_s18, %s1859_s10 }
  0x40   : > { %v654_v10 = vmul.f32 %v2064_v6, %v140_v0  ;;  %v655_v11 = vmul.f32 %v2064_v6, %v141_v1  ;;  %v656_v12 = vmul.f32 %v2064_v6, %v142_v2  ;;  %v657_v13 = vmul.f32 %v2064_v6, %v143_v3  ;;  %v166_v51 = vld [vmem:[%s2052_s6 + $0xd0] sm:$0xff]  ;;  %v167_v55 = vld [vmem:[%s2052_s6 + $0xd8] sm:$0xff]  ;;  %v168_v56 = vld [vmem:[%s2052_s6 + $0xe0] sm:$0xff] }
  0x41   : > { %v658_v17 = vmul.f32 %v2064_v6, %v144_v4  ;;  %v659_v18 = vmul.f32 %v2064_v6, %v145_v5  ;;  %v660_v19 = vmul.f32 %v2064_v6, %v146_v7  ;;  %v661_v20 = vmul.f32 %v2064_v6, %v147_v8  ;;  %v169_v57 = vld [vmem:[%s2052_s6 + $0xe8] sm:$0xff]  ;;  %v170_v61 = vld [vmem:[%s2052_s6 + $0xf0] sm:$0xff]  ;;  %v171_v62 = vld [vmem:[%s2052_s6 + $0xf8] sm:$0xff]  ;;  %p1868_p8 = por %p1867_p7, %p1866_p5 }
  0x42   : > { %1166 = vst [vmem:[%s2085_s21] sm:$0xff] %v654_v10  ;;  %1167 = vst [vmem:[%s2085_s21 + $0x8] sm:$0xff] %v655_v11  ;;  %v662_v24 = vmul.f32 %v2064_v6, %v148_v9  ;;  %v663_v25 = vmul.f32 %v2064_v6, %v149_v14  ;;  %v664_v26 = vmul.f32 %v2064_v6, %v150_v15  ;;  %v172_v63 = vld [vmem:[%s2052_s6 + $0x100] sm:$0xff]  ;;  %v173_v3 = vld [vmem:[%s2052_s6 + $0x108] sm:$0xff] }
  0x43   : > { %1168 = vst [vmem:[%s2085_s21 + $0x10] sm:$0xff] %v656_v12  ;;  %1169 = vst [vmem:[%s2085_s21 + $0x18] sm:$0xff] %v657_v13  ;;  %v665_v27 = vmul.f32 %v2064_v6, %v151_v16  ;;  %v666_v31 = vmul.f32 %v2064_v6, %v152_v21  ;;  %v667_v32 = vmul.f32 %v2064_v6, %v153_v22  ;;  %v174_v4 = vld [vmem:[%s2052_s6 + $0x110] sm:$0xff]  ;;  %v175_v5 = vld [vmem:[%s2052_s6 + $0x118] sm:$0xff]  ;;  %p1869_p10 = pnand %p1868_p8, %p1862_p4 }
  0x44   : > { %1170 = vst [vmem:[%s2085_s21 + $0x20] sm:$0xff] %v658_v17  ;;  %1171 = vst [vmem:[%s2085_s21 + $0x28] sm:$0xff] %v659_v18  ;;  %v668_v33 = vmul.f32 %v2064_v6, %v154_v23  ;;  %v669_v34 = vmul.f32 %v2064_v6, %v155_v28  ;;  %v670_v38 = vmul.f32 %v2064_v6, %v156_v29  ;;  %v176_v10 = vld [vmem:[%s2052_s6 + $0x120] sm:$0xff]  ;;  %v177_v11 = vld [vmem:[%s2052_s6 + $0x128] sm:$0xff] }
  0x45   : > { %1172 = vst [vmem:[%s2085_s21 + $0x30] sm:$0xff] %v660_v19  ;;  %1173 = vst [vmem:[%s2085_s21 + $0x38] sm:$0xff] %v661_v20  ;;  %v671_v39 = vmul.f32 %v2064_v6, %v157_v30  ;;  %v672_v40 = vmul.f32 %v2064_v6, %v158_v35  ;;  %v673_v41 = vmul.f32 %v2064_v6, %v159_v36  ;;  %v178_v12 = vld [vmem:[%s2052_s6 + $0x130] sm:$0xff]  ;;  %v179_v16 = vld [vmem:[%s2052_s6 + $0x138] sm:$0xff] }
  0x46   : > { %1174 = vst [vmem:[%s2085_s21 + $0x40] sm:$0xff] %v662_v24  ;;  %1175 = vst [vmem:[%s2085_s21 + $0x48] sm:$0xff] %v663_v25  ;;  %v674_v45 = vmul.f32 %v2064_v6, %v160_v37  ;;  %v675_v46 = vmul.f32 %v2064_v6, %v161_v42  ;;  %v676_v47 = vmul.f32 %v2064_v6, %v162_v43  ;;  %v180_v17 = vld [vmem:[%s2052_s6 + $0x140] sm:$0xff]  ;;  %v181_v18 = vld [vmem:[%s2052_s6 + $0x148] sm:$0xff] }
  0x47   : > { %1176 = vst [vmem:[%s2085_s21 + $0x50] sm:$0xff] %v664_v26  ;;  %1177 = vst [vmem:[%s2085_s21 + $0x58] sm:$0xff] %v665_v27  ;;  %v677_v48 = vmul.f32 %v2064_v6, %v163_v44  ;;  %v678_v52 = vmul.f32 %v2064_v6, %v164_v49  ;;  %v679_v53 = vmul.f32 %v2064_v6, %v165_v50  ;;  %v182_v22 = vld [vmem:[%s2052_s6 + $0x150] sm:$0xff]  ;;  %v183_v23 = vld [vmem:[%s2052_s6 + $0x158] sm:$0xff] }
  0x48   : > { %1178 = vst [vmem:[%s2085_s21 + $0x60] sm:$0xff] %v666_v31  ;;  %1179 = vst [vmem:[%s2085_s21 + $0x68] sm:$0xff] %v667_v32  ;;  %v680_v54 = vmul.f32 %v2064_v6, %v166_v51  ;;  %v681_v58 = vmul.f32 %v2064_v6, %v167_v55  ;;  %v682_v59 = vmul.f32 %v2064_v6, %v168_v56  ;;  %v184_v24 = vld [vmem:[%s2052_s6 + $0x160] sm:$0xff]  ;;  %v185_v28 = vld [vmem:[%s2052_s6 + $0x168] sm:$0xff] }
  0x49   : > { %1180 = vst [vmem:[%s2085_s21 + $0x70] sm:$0xff] %v668_v33  ;;  %1181 = vst [vmem:[%s2085_s21 + $0x78] sm:$0xff] %v669_v34  ;;  %v683_v60 = vmul.f32 %v2064_v6, %v169_v57  ;;  %v684_v0 = vmul.f32 %v2064_v6, %v170_v61  ;;  %v685_v1 = vmul.f32 %v2064_v6, %v171_v62  ;;  %v186_v29 = vld [vmem:[%s2052_s6 + $0x170] sm:$0xff]  ;;  %v187_v30 = vld [vmem:[%s2052_s6 + $0x178] sm:$0xff] }
  0x4a   : > { %1182 = vst [vmem:[%s2085_s21 + $0x80] sm:$0xff] %v670_v38  ;;  %1183 = vst [vmem:[%s2085_s21 + $0x88] sm:$0xff] %v671_v39  ;;  %v686_v2 = vmul.f32 %v2064_v6, %v172_v63  ;;  %v687_v7 = vmul.f32 %v2064_v6, %v173_v3  ;;  %v688_v8 = vmul.f32 %v2064_v6, %v174_v4  ;;  %v188_v34 = vld [vmem:[%s2052_s6 + $0x180] sm:$0xff]  ;;  %v189_v35 = vld [vmem:[%s2052_s6 + $0x188] sm:$0xff] }
  0x4b   : > { %1184 = vst [vmem:[%s2085_s21 + $0x90] sm:$0xff] %v672_v40  ;;  %1185 = vst [vmem:[%s2085_s21 + $0x98] sm:$0xff] %v673_v41  ;;  %v689_v9 = vmul.f32 %v2064_v6, %v175_v5  ;;  %v690_v13 = vmul.f32 %v2064_v6, %v176_v10  ;;  %v691_v14 = vmul.f32 %v2064_v6, %v177_v11  ;;  %v190_v36 = vld [vmem:[%s2052_s6 + $0x190] sm:$0xff]  ;;  %v191_v40 = vld [vmem:[%s2052_s6 + $0x198] sm:$0xff] }
  0x4c   : > { %1186 = vst [vmem:[%s2085_s21 + $0xa0] sm:$0xff] %v674_v45  ;;  %1187 = vst [vmem:[%s2085_s21 + $0xa8] sm:$0xff] %v675_v46  ;;  %v692_v15 = vmul.f32 %v2064_v6, %v178_v12  ;;  %v693_v19 = vmul.f32 %v2064_v6, %v179_v16  ;;  %v694_v20 = vmul.f32 %v2064_v6, %v180_v17  ;;  %v192_v41 = vld [vmem:[%s2052_s6 + $0x1a0] sm:$0xff]  ;;  %v193_v42 = vld [vmem:[%s2052_s6 + $0x1a8] sm:$0xff] }
  0x4d   : > { %1188 = vst [vmem:[%s2085_s21 + $0xb0] sm:$0xff] %v676_v47  ;;  %1189 = vst [vmem:[%s2085_s21 + $0xb8] sm:$0xff] %v677_v48  ;;  %v695_v21 = vmul.f32 %v2064_v6, %v181_v18  ;;  %v696_v25 = vmul.f32 %v2064_v6, %v182_v22  ;;  %v697_v26 = vmul.f32 %v2064_v6, %v183_v23  ;;  %v194_v46 = vld [vmem:[%s2052_s6 + $0x1b0] sm:$0xff]  ;;  %v195_v47 = vld [vmem:[%s2052_s6 + $0x1b8] sm:$0xff] }
  0x4e   : > { %1190 = vst [vmem:[%s2085_s21 + $0xc0] sm:$0xff] %v678_v52  ;;  %1191 = vst [vmem:[%s2085_s21 + $0xc8] sm:$0xff] %v679_v53  ;;  %v698_v27 = vmul.f32 %v2064_v6, %v184_v24  ;;  %v699_v31 = vmul.f32 %v2064_v6, %v185_v28  ;;  %v700_v32 = vmul.f32 %v2064_v6, %v186_v29  ;;  %v196_v48 = vld [vmem:[%s2052_s6 + $0x1c0] sm:$0xff]  ;;  %v197_v52 = vld [vmem:[%s2052_s6 + $0x1c8] sm:$0xff] }
  0x4f   : > { %1192 = vst [vmem:[%s2085_s21 + $0xd0] sm:$0xff] %v680_v54  ;;  %1193 = vst [vmem:[%s2085_s21 + $0xd8] sm:$0xff] %v681_v58  ;;  %v701_v33 = vmul.f32 %v2064_v6, %v187_v30  ;;  %v702_v37 = vmul.f32 %v2064_v6, %v188_v34  ;;  %v703_v38 = vmul.f32 %v2064_v6, %v189_v35  ;;  %v198_v53 = vld [vmem:[%s2052_s6 + $0x1d0] sm:$0xff]  ;;  %v199_v54 = vld [vmem:[%s2052_s6 + $0x1d8] sm:$0xff] }
  0x50   : > { %1194 = vst [vmem:[%s2085_s21 + $0xe0] sm:$0xff] %v682_v59  ;;  %1195 = vst [vmem:[%s2085_s21 + $0xe8] sm:$0xff] %v683_v60  ;;  %v704_v39 = vmul.f32 %v2064_v6, %v190_v36  ;;  %v705_v43 = vmul.f32 %v2064_v6, %v191_v40  ;;  %v706_v44 = vmul.f32 %v2064_v6, %v192_v41  ;;  %v200_v58 = vld [vmem:[%s2052_s6 + $0x1e0] sm:$0xff]  ;;  %v201_v59 = vld [vmem:[%s2052_s6 + $0x1e8] sm:$0xff] }
  0x51   : > { %1196 = vst [vmem:[%s2085_s21 + $0xf0] sm:$0xff] %v684_v0  ;;  %1197 = vst [vmem:[%s2085_s21 + $0xf8] sm:$0xff] %v685_v1  ;;  %v707_v45 = vmul.f32 %v2064_v6, %v193_v42  ;;  %v708_v49 = vmul.f32 %v2064_v6, %v194_v46  ;;  %v709_v50 = vmul.f32 %v2064_v6, %v195_v47  ;;  %v202_v60 = vld [vmem:[%s2052_s6 + $0x1f0] sm:$0xff]  ;;  %v203_v0 = vld [vmem:[%s2052_s6 + $0x1f8] sm:$0xff] }
  0x52   : > { %1198 = vst [vmem:[%s2085_s21 + $0x100] sm:$0xff] %v686_v2  ;;  %1199 = vst [vmem:[%s2085_s21 + $0x108] sm:$0xff] %v687_v7  ;;  %v710_v51 = vmul.f32 %v2064_v6, %v196_v48  ;;  %v711_v55 = vmul.f32 %v2064_v6, %v197_v52  ;;  %v712_v56 = vmul.f32 %v2064_v6, %v198_v53  ;;  %v204_v1 = vld [vmem:[%s2052_s6 + $0x200] sm:$0xff]  ;;  %v205_v2 = vld [vmem:[%s2052_s6 + $0x208] sm:$0xff] }
  0x53   : > { %1200 = vst [vmem:[%s2085_s21 + $0x110] sm:$0xff] %v688_v8  ;;  %1201 = vst [vmem:[%s2085_s21 + $0x118] sm:$0xff] %v689_v9  ;;  %v713_v57 = vmul.f32 %v2064_v6, %v199_v54  ;;  %v714_v61 = vmul.f32 %v2064_v6, %v200_v58  ;;  %v715_v62 = vmul.f32 %v2064_v6, %v201_v59  ;;  %v206_v7 = vld [vmem:[%s2052_s6 + $0x210] sm:$0xff]  ;;  %v207_v8 = vld [vmem:[%s2052_s6 + $0x218] sm:$0xff] }
  0x54   : > { %1202 = vst [vmem:[%s2085_s21 + $0x120] sm:$0xff] %v690_v13  ;;  %1203 = vst [vmem:[%s2085_s21 + $0x128] sm:$0xff] %v691_v14  ;;  %v716_v63 = vmul.f32 %v2064_v6, %v202_v60  ;;  %v717_v3 = vmul.f32 %v2064_v6, %v203_v0  ;;  %v718_v4 = vmul.f32 %v2064_v6, %v204_v1  ;;  %v208_v9 = vld [vmem:[%s2052_s6 + $0x220] sm:$0xff]  ;;  %v209_v13 = vld [vmem:[%s2052_s6 + $0x228] sm:$0xff] }
  0x55   : > { %1204 = vst [vmem:[%s2085_s21 + $0x130] sm:$0xff] %v692_v15  ;;  %1205 = vst [vmem:[%s2085_s21 + $0x138] sm:$0xff] %v693_v19  ;;  %v719_v5 = vmul.f32 %v2064_v6, %v205_v2  ;;  %v720_v10 = vmul.f32 %v2064_v6, %v206_v7  ;;  %v721_v11 = vmul.f32 %v2064_v6, %v207_v8  ;;  %v210_v14 = vld [vmem:[%s2052_s6 + $0x230] sm:$0xff]  ;;  %v211_v15 = vld [vmem:[%s2052_s6 + $0x238] sm:$0xff] }
  0x56   : > { %1206 = vst [vmem:[%s2085_s21 + $0x140] sm:$0xff] %v694_v20  ;;  %1207 = vst [vmem:[%s2085_s21 + $0x148] sm:$0xff] %v695_v21  ;;  %v722_v12 = vmul.f32 %v2064_v6, %v208_v9  ;;  %v723_v16 = vmul.f32 %v2064_v6, %v209_v13  ;;  %v724_v17 = vmul.f32 %v2064_v6, %v210_v14  ;;  %v212_v19 = vld [vmem:[%s2052_s6 + $0x240] sm:$0xff]  ;;  %v213_v20 = vld [vmem:[%s2052_s6 + $0x248] sm:$0xff] }
  0x57   : > { %1208 = vst [vmem:[%s2085_s21 + $0x150] sm:$0xff] %v696_v25  ;;  %1209 = vst [vmem:[%s2085_s21 + $0x158] sm:$0xff] %v697_v26  ;;  %v725_v18 = vmul.f32 %v2064_v6, %v211_v15  ;;  %v214_v21 = vld [vmem:[%s2052_s6 + $0x250] sm:$0xff]  ;;  %v726_v22 = vmul.f32 %v2064_v6, %v212_v19  ;;  %v727_v23 = vmul.f32 %v2064_v6, %v213_v20  ;;  %v215_v25 = vld [vmem:[%s2052_s6 + $0x258] sm:$0xff] }
  0x58   : > { %1210 = vst [vmem:[%s2085_s21 + $0x160] sm:$0xff] %v698_v27  ;;  %1211 = vst [vmem:[%s2085_s21 + $0x168] sm:$0xff] %v699_v31  ;;  %v728_v24 = vmul.f32 %v2064_v6, %v214_v21  ;;  %v216_v26 = vld [vmem:[%s2052_s6 + $0x260] sm:$0xff]  ;;  %v217_v27 = vld [vmem:[%s2052_s6 + $0x268] sm:$0xff]  ;;  %v729_v28 = vmul.f32 %v2064_v6, %v215_v25 }
  0x59   : > { %1212 = vst [vmem:[%s2085_s21 + $0x170] sm:$0xff] %v700_v32  ;;  %1213 = vst [vmem:[%s2085_s21 + $0x178] sm:$0xff] %v701_v33  ;;  %v730_v29 = vmul.f32 %v2064_v6, %v216_v26  ;;  %v731_v30 = vmul.f32 %v2064_v6, %v217_v27  ;;  %v218_v31 = vld [vmem:[%s2052_s6 + $0x270] sm:$0xff]  ;;  %v219_v32 = vld [vmem:[%s2052_s6 + $0x278] sm:$0xff] }
  0x5a   : > { %1214 = vst [vmem:[%s2085_s21 + $0x180] sm:$0xff] %v702_v37  ;;  %1215 = vst [vmem:[%s2085_s21 + $0x188] sm:$0xff] %v703_v38  ;;  %v220_v33 = vld [vmem:[%s2052_s6 + $0x280] sm:$0xff]  ;;  %v732_v34 = vmul.f32 %v2064_v6, %v218_v31  ;;  %v733_v35 = vmul.f32 %v2064_v6, %v219_v32  ;;  %v221_v37 = vld [vmem:[%s2052_s6 + $0x288] sm:$0xff] }
  0x5b   : > { %1216 = vst [vmem:[%s2085_s21 + $0x190] sm:$0xff] %v704_v39  ;;  %1217 = vst [vmem:[%s2085_s21 + $0x198] sm:$0xff] %v705_v43  ;;  %v734_v36 = vmul.f32 %v2064_v6, %v220_v33  ;;  %v222_v38 = vld [vmem:[%s2052_s6 + $0x290] sm:$0xff]  ;;  %v223_v39 = vld [vmem:[%s2052_s6 + $0x298] sm:$0xff]  ;;  %v735_v40 = vmul.f32 %v2064_v6, %v221_v37 }
  0x5c   : > { %1218 = vst [vmem:[%s2085_s21 + $0x1a0] sm:$0xff] %v706_v44  ;;  %1219 = vst [vmem:[%s2085_s21 + $0x1a8] sm:$0xff] %v707_v45  ;;  %v736_v41 = vmul.f32 %v2064_v6, %v222_v38  ;;  %v737_v42 = vmul.f32 %v2064_v6, %v223_v39  ;;  %v224_v43 = vld [vmem:[%s2052_s6 + $0x2a0] sm:$0xff]  ;;  %v225_v44 = vld [vmem:[%s2052_s6 + $0x2a8] sm:$0xff] }
  0x5d   : > { %1220 = vst [vmem:[%s2085_s21 + $0x1b0] sm:$0xff] %v708_v49  ;;  %1221 = vst [vmem:[%s2085_s21 + $0x1b8] sm:$0xff] %v709_v50  ;;  %v226_v45 = vld [vmem:[%s2052_s6 + $0x2b0] sm:$0xff]  ;;  %v738_v46 = vmul.f32 %v2064_v6, %v224_v43  ;;  %v739_v47 = vmul.f32 %v2064_v6, %v225_v44  ;;  %v227_v49 = vld [vmem:[%s2052_s6 + $0x2b8] sm:$0xff] }
  0x5e   : > { %1222 = vst [vmem:[%s2085_s21 + $0x1c0] sm:$0xff] %v710_v51  ;;  %1223 = vst [vmem:[%s2085_s21 + $0x1c8] sm:$0xff] %v711_v55  ;;  %v740_v48 = vmul.f32 %v2064_v6, %v226_v45  ;;  %v228_v50 = vld [vmem:[%s2052_s6 + $0x2c0] sm:$0xff]  ;;  %v229_v51 = vld [vmem:[%s2052_s6 + $0x2c8] sm:$0xff]  ;;  %v741_v52 = vmul.f32 %v2064_v6, %v227_v49 }
  0x5f   : > { %1224 = vst [vmem:[%s2085_s21 + $0x1d0] sm:$0xff] %v712_v56  ;;  %1225 = vst [vmem:[%s2085_s21 + $0x1d8] sm:$0xff] %v713_v57  ;;  %v742_v53 = vmul.f32 %v2064_v6, %v228_v50  ;;  %v743_v54 = vmul.f32 %v2064_v6, %v229_v51  ;;  %v230_v55 = vld [vmem:[%s2052_s6 + $0x2d0] sm:$0xff]  ;;  %v231_v56 = vld [vmem:[%s2052_s6 + $0x2d8] sm:$0xff] }
  0x60   : > { %1226 = vst [vmem:[%s2085_s21 + $0x1e0] sm:$0xff] %v714_v61  ;;  %1227 = vst [vmem:[%s2085_s21 + $0x1e8] sm:$0xff] %v715_v62  ;;  %v232_v57 = vld [vmem:[%s2052_s6 + $0x2e0] sm:$0xff]  ;;  %v744_v58 = vmul.f32 %v2064_v6, %v230_v55  ;;  %v745_v59 = vmul.f32 %v2064_v6, %v231_v56  ;;  %v233_v61 = vld [vmem:[%s2052_s6 + $0x2e8] sm:$0xff] }
  0x61   : > { %1228 = vst [vmem:[%s2085_s21 + $0x1f0] sm:$0xff] %v716_v63  ;;  %1229 = vst [vmem:[%s2085_s21 + $0x1f8] sm:$0xff] %v717_v3  ;;  %v746_v60 = vmul.f32 %v2064_v6, %v232_v57  ;;  %v234_v62 = vld [vmem:[%s2052_s6 + $0x2f0] sm:$0xff]  ;;  %v235_v63 = vld [vmem:[%s2052_s6 + $0x2f8] sm:$0xff]  ;;  %v747_v0 = vmul.f32 %v2064_v6, %v233_v61 }
  0x62   : > { %1230 = vst [vmem:[%s2085_s21 + $0x200] sm:$0xff] %v718_v4  ;;  %1231 = vst [vmem:[%s2085_s21 + $0x208] sm:$0xff] %v719_v5  ;;  %v748_v1 = vmul.f32 %v2064_v6, %v234_v62  ;;  %v749_v2 = vmul.f32 %v2064_v6, %v235_v63  ;;  %v236_v3 = vld [vmem:[%s2052_s6 + $0x300] sm:$0xff]  ;;  %v237_v4 = vld [vmem:[%s2052_s6 + $0x308] sm:$0xff] }
  0x63   : > { %1232 = vst [vmem:[%s2085_s21 + $0x210] sm:$0xff] %v720_v10  ;;  %1233 = vst [vmem:[%s2085_s21 + $0x218] sm:$0xff] %v721_v11  ;;  %v238_v5 = vld [vmem:[%s2052_s6 + $0x310] sm:$0xff]  ;;  %v750_v7 = vmul.f32 %v2064_v6, %v236_v3  ;;  %v751_v8 = vmul.f32 %v2064_v6, %v237_v4  ;;  %v239_v10 = vld [vmem:[%s2052_s6 + $0x318] sm:$0xff] }
  0x64   : > { %1234 = vst [vmem:[%s2085_s21 + $0x220] sm:$0xff] %v722_v12  ;;  %1235 = vst [vmem:[%s2085_s21 + $0x228] sm:$0xff] %v723_v16  ;;  %v752_v9 = vmul.f32 %v2064_v6, %v238_v5  ;;  %v240_v11 = vld [vmem:[%s2052_s6 + $0x320] sm:$0xff]  ;;  %v241_v12 = vld [vmem:[%s2052_s6 + $0x328] sm:$0xff]  ;;  %v753_v13 = vmul.f32 %v2064_v6, %v239_v10 }
  0x65   : > { %1236 = vst [vmem:[%s2085_s21 + $0x230] sm:$0xff] %v724_v17  ;;  %1237 = vst [vmem:[%s2085_s21 + $0x238] sm:$0xff] %v725_v18  ;;  %v754_v14 = vmul.f32 %v2064_v6, %v240_v11  ;;  %v755_v15 = vmul.f32 %v2064_v6, %v241_v12  ;;  %v242_v16 = vld [vmem:[%s2052_s6 + $0x330] sm:$0xff]  ;;  %v243_v17 = vld [vmem:[%s2052_s6 + $0x338] sm:$0xff] }
  0x66   : > { %1238 = vst [vmem:[%s2085_s21 + $0x240] sm:$0xff] %v726_v22  ;;  %1239 = vst [vmem:[%s2085_s21 + $0x248] sm:$0xff] %v727_v23  ;;  %v244_v18 = vld [vmem:[%s2052_s6 + $0x340] sm:$0xff]  ;;  %v756_v19 = vmul.f32 %v2064_v6, %v242_v16  ;;  %v757_v20 = vmul.f32 %v2064_v6, %v243_v17  ;;  %v245_v22 = vld [vmem:[%s2052_s6 + $0x348] sm:$0xff] }
  0x67   : > { %1240 = vst [vmem:[%s2085_s21 + $0x250] sm:$0xff] %v728_v24  ;;  %1241 = vst [vmem:[%s2085_s21 + $0x258] sm:$0xff] %v729_v28  ;;  %v758_v21 = vmul.f32 %v2064_v6, %v244_v18  ;;  %v246_v23 = vld [vmem:[%s2052_s6 + $0x350] sm:$0xff]  ;;  %v247_v24 = vld [vmem:[%s2052_s6 + $0x358] sm:$0xff]  ;;  %v759_v25 = vmul.f32 %v2064_v6, %v245_v22 }
  0x68   : > { %1242 = vst [vmem:[%s2085_s21 + $0x260] sm:$0xff] %v730_v29  ;;  %1243 = vst [vmem:[%s2085_s21 + $0x268] sm:$0xff] %v731_v30  ;;  %v760_v26 = vmul.f32 %v2064_v6, %v246_v23  ;;  %v761_v27 = vmul.f32 %v2064_v6, %v247_v24  ;;  %v248_v28 = vld [vmem:[%s2052_s6 + $0x360] sm:$0xff]  ;;  %v249_v29 = vld [vmem:[%s2052_s6 + $0x368] sm:$0xff] }
  0x69   : > { %1244 = vst [vmem:[%s2085_s21 + $0x270] sm:$0xff] %v732_v34  ;;  %1245 = vst [vmem:[%s2085_s21 + $0x278] sm:$0xff] %v733_v35  ;;  %v250_v30 = vld [vmem:[%s2052_s6 + $0x370] sm:$0xff]  ;;  %v762_v31 = vmul.f32 %v2064_v6, %v248_v28  ;;  %v763_v32 = vmul.f32 %v2064_v6, %v249_v29  ;;  %v251_v34 = vld [vmem:[%s2052_s6 + $0x378] sm:$0xff] }
  0x6a   : > { %1246 = vst [vmem:[%s2085_s21 + $0x280] sm:$0xff] %v734_v36  ;;  %1247 = vst [vmem:[%s2085_s21 + $0x288] sm:$0xff] %v735_v40  ;;  %v764_v33 = vmul.f32 %v2064_v6, %v250_v30  ;;  %v252_v35 = vld [vmem:[%s2052_s6 + $0x380] sm:$0xff]  ;;  %v253_v36 = vld [vmem:[%s2052_s6 + $0x388] sm:$0xff]  ;;  %v765_v37 = vmul.f32 %v2064_v6, %v251_v34 }
  0x6b   : > { %1248 = vst [vmem:[%s2085_s21 + $0x290] sm:$0xff] %v736_v41  ;;  %1249 = vst [vmem:[%s2085_s21 + $0x298] sm:$0xff] %v737_v42  ;;  %v766_v38 = vmul.f32 %v2064_v6, %v252_v35  ;;  %v767_v39 = vmul.f32 %v2064_v6, %v253_v36  ;;  %v254_v40 = vld [vmem:[%s2052_s6 + $0x390] sm:$0xff]  ;;  %v255_v41 = vld [vmem:[%s2052_s6 + $0x398] sm:$0xff] }
  0x6c   : > { %1250 = vst [vmem:[%s2085_s21 + $0x2a0] sm:$0xff] %v738_v46  ;;  %1251 = vst [vmem:[%s2085_s21 + $0x2a8] sm:$0xff] %v739_v47  ;;  %v256_v42 = vld [vmem:[%s2052_s6 + $0x3a0] sm:$0xff]  ;;  %v768_v43 = vmul.f32 %v2064_v6, %v254_v40  ;;  %v769_v44 = vmul.f32 %v2064_v6, %v255_v41  ;;  %v257_v46 = vld [vmem:[%s2052_s6 + $0x3a8] sm:$0xff] }
  0x6d   : > { %1252 = vst [vmem:[%s2085_s21 + $0x2b0] sm:$0xff] %v740_v48  ;;  %1253 = vst [vmem:[%s2085_s21 + $0x2b8] sm:$0xff] %v741_v52  ;;  %v770_v45 = vmul.f32 %v2064_v6, %v256_v42  ;;  %v258_v47 = vld [vmem:[%s2052_s6 + $0x3b0] sm:$0xff]  ;;  %v259_v48 = vld [vmem:[%s2052_s6 + $0x3b8] sm:$0xff]  ;;  %v771_v49 = vmul.f32 %v2064_v6, %v257_v46 }
  0x6e   : > { %1254 = vst [vmem:[%s2085_s21 + $0x2c0] sm:$0xff] %v742_v53  ;;  %1255 = vst [vmem:[%s2085_s21 + $0x2c8] sm:$0xff] %v743_v54  ;;  %v772_v50 = vmul.f32 %v2064_v6, %v258_v47  ;;  %v773_v51 = vmul.f32 %v2064_v6, %v259_v48  ;;  %v260_v52 = vld [vmem:[%s2052_s6 + $0x3c0] sm:$0xff]  ;;  %v261_v53 = vld [vmem:[%s2052_s6 + $0x3c8] sm:$0xff] }
  0x6f   : > { %1256 = vst [vmem:[%s2085_s21 + $0x2d0] sm:$0xff] %v744_v58  ;;  %1257 = vst [vmem:[%s2085_s21 + $0x2d8] sm:$0xff] %v745_v59  ;;  %v262_v54 = vld [vmem:[%s2052_s6 + $0x3d0] sm:$0xff]  ;;  %v774_v55 = vmul.f32 %v2064_v6, %v260_v52  ;;  %v775_v56 = vmul.f32 %v2064_v6, %v261_v53  ;;  %v263_v58 = vld [vmem:[%s2052_s6 + $0x3d8] sm:$0xff] }
  0x70   : > { %1258 = vst [vmem:[%s2085_s21 + $0x2e0] sm:$0xff] %v746_v60  ;;  %1259 = vst [vmem:[%s2085_s21 + $0x2e8] sm:$0xff] %v747_v0  ;;  %v776_v57 = vmul.f32 %v2064_v6, %v262_v54  ;;  %v264_v59 = vld [vmem:[%s2052_s6 + $0x3e0] sm:$0xff]  ;;  %v265_v60 = vld [vmem:[%s2052_s6 + $0x3e8] sm:$0xff]  ;;  %v777_v61 = vmul.f32 %v2064_v6, %v263_v58 }
  0x71   : > { %1260 = vst [vmem:[%s2085_s21 + $0x2f0] sm:$0xff] %v748_v1  ;;  %1261 = vst [vmem:[%s2085_s21 + $0x2f8] sm:$0xff] %v749_v2  ;;  %v778_v62 = vmul.f32 %v2064_v6, %v264_v59  ;;  %v779_v63 = vmul.f32 %v2064_v6, %v265_v60  ;;  %v266_v0 = vld [vmem:[%s2052_s6 + $0x3f0] sm:$0xff]  ;;  %v267_v1 = vld [vmem:[%s2052_s6 + $0x3f8] sm:$0xff] }
  0x72   : > { %1262 = vst [vmem:[%s2085_s21 + $0x300] sm:$0xff] %v750_v7  ;;  %1263 = vst [vmem:[%s2085_s21 + $0x308] sm:$0xff] %v751_v8  ;;  %v268_v2 = vld [vmem:[%s2052_s6 + $0x400] sm:$0xff]  ;;  %v780_v3 = vmul.f32 %v2064_v6, %v266_v0  ;;  %v781_v4 = vmul.f32 %v2064_v6, %v267_v1  ;;  %v269_v7 = vld [vmem:[%s2052_s6 + $0x408] sm:$0xff] }
  0x73   : > { %1264 = vst [vmem:[%s2085_s21 + $0x310] sm:$0xff] %v752_v9  ;;  %1265 = vst [vmem:[%s2085_s21 + $0x318] sm:$0xff] %v753_v13  ;;  %v782_v5 = vmul.f32 %v2064_v6, %v268_v2  ;;  %v270_v8 = vld [vmem:[%s2052_s6 + $0x410] sm:$0xff]  ;;  %v271_v9 = vld [vmem:[%s2052_s6 + $0x418] sm:$0xff]  ;;  %v783_v10 = vmul.f32 %v2064_v6, %v269_v7 }
  0x74   : > { %1266 = vst [vmem:[%s2085_s21 + $0x320] sm:$0xff] %v754_v14  ;;  %1267 = vst [vmem:[%s2085_s21 + $0x328] sm:$0xff] %v755_v15  ;;  %v784_v11 = vmul.f32 %v2064_v6, %v270_v8  ;;  %v785_v12 = vmul.f32 %v2064_v6, %v271_v9  ;;  %v272_v13 = vld [vmem:[%s2052_s6 + $0x420] sm:$0xff]  ;;  %v273_v14 = vld [vmem:[%s2052_s6 + $0x428] sm:$0xff] }
  0x75   : > { %1268 = vst [vmem:[%s2085_s21 + $0x330] sm:$0xff] %v756_v19  ;;  %1269 = vst [vmem:[%s2085_s21 + $0x338] sm:$0xff] %v757_v20  ;;  %v274_v15 = vld [vmem:[%s2052_s6 + $0x430] sm:$0xff]  ;;  %v786_v16 = vmul.f32 %v2064_v6, %v272_v13  ;;  %v787_v17 = vmul.f32 %v2064_v6, %v273_v14  ;;  %v275_v19 = vld [vmem:[%s2052_s6 + $0x438] sm:$0xff] }
  0x76   : > { %1270 = vst [vmem:[%s2085_s21 + $0x340] sm:$0xff] %v758_v21  ;;  %1271 = vst [vmem:[%s2085_s21 + $0x348] sm:$0xff] %v759_v25  ;;  %v788_v18 = vmul.f32 %v2064_v6, %v274_v15  ;;  %v276_v20 = vld [vmem:[%s2052_s6 + $0x440] sm:$0xff]  ;;  %v277_v21 = vld [vmem:[%s2052_s6 + $0x448] sm:$0xff]  ;;  %v789_v22 = vmul.f32 %v2064_v6, %v275_v19 }
  0x77   : > { %1272 = vst [vmem:[%s2085_s21 + $0x350] sm:$0xff] %v760_v26  ;;  %1273 = vst [vmem:[%s2085_s21 + $0x358] sm:$0xff] %v761_v27  ;;  %v790_v23 = vmul.f32 %v2064_v6, %v276_v20  ;;  %v791_v24 = vmul.f32 %v2064_v6, %v277_v21  ;;  %v278_v25 = vld [vmem:[%s2052_s6 + $0x450] sm:$0xff]  ;;  %v279_v26 = vld [vmem:[%s2052_s6 + $0x458] sm:$0xff] }
  0x78   : > { %1274 = vst [vmem:[%s2085_s21 + $0x360] sm:$0xff] %v762_v31  ;;  %1275 = vst [vmem:[%s2085_s21 + $0x368] sm:$0xff] %v763_v32  ;;  %v280_v27 = vld [vmem:[%s2052_s6 + $0x460] sm:$0xff]  ;;  %v792_v28 = vmul.f32 %v2064_v6, %v278_v25  ;;  %v793_v29 = vmul.f32 %v2064_v6, %v279_v26  ;;  %v281_v31 = vld [vmem:[%s2052_s6 + $0x468] sm:$0xff] }
  0x79   : > { %1276 = vst [vmem:[%s2085_s21 + $0x370] sm:$0xff] %v764_v33  ;;  %1277 = vst [vmem:[%s2085_s21 + $0x378] sm:$0xff] %v765_v37  ;;  %v794_v30 = vmul.f32 %v2064_v6, %v280_v27  ;;  %v282_v32 = vld [vmem:[%s2052_s6 + $0x470] sm:$0xff]  ;;  %v283_v33 = vld [vmem:[%s2052_s6 + $0x478] sm:$0xff]  ;;  %v795_v34 = vmul.f32 %v2064_v6, %v281_v31 }
  0x7a   : > { %1278 = vst [vmem:[%s2085_s21 + $0x380] sm:$0xff] %v766_v38  ;;  %1279 = vst [vmem:[%s2085_s21 + $0x388] sm:$0xff] %v767_v39  ;;  %v796_v35 = vmul.f32 %v2064_v6, %v282_v32  ;;  %v797_v36 = vmul.f32 %v2064_v6, %v283_v33  ;;  %v284_v37 = vld [vmem:[%s2052_s6 + $0x480] sm:$0xff]  ;;  %v285_v38 = vld [vmem:[%s2052_s6 + $0x488] sm:$0xff] }
  0x7b   : > { %1280 = vst [vmem:[%s2085_s21 + $0x390] sm:$0xff] %v768_v43  ;;  %1281 = vst [vmem:[%s2085_s21 + $0x398] sm:$0xff] %v769_v44  ;;  %v286_v39 = vld [vmem:[%s2052_s6 + $0x490] sm:$0xff]  ;;  %v798_v40 = vmul.f32 %v2064_v6, %v284_v37  ;;  %v799_v41 = vmul.f32 %v2064_v6, %v285_v38  ;;  %v287_v43 = vld [vmem:[%s2052_s6 + $0x498] sm:$0xff] }
  0x7c   : > { %1282 = vst [vmem:[%s2085_s21 + $0x3a0] sm:$0xff] %v770_v45  ;;  %1283 = vst [vmem:[%s2085_s21 + $0x3a8] sm:$0xff] %v771_v49  ;;  %v800_v42 = vmul.f32 %v2064_v6, %v286_v39  ;;  %v288_v44 = vld [vmem:[%s2052_s6 + $0x4a0] sm:$0xff]  ;;  %v289_v45 = vld [vmem:[%s2052_s6 + $0x4a8] sm:$0xff]  ;;  %v801_v46 = vmul.f32 %v2064_v6, %v287_v43 }
  0x7d   : > { %1284 = vst [vmem:[%s2085_s21 + $0x3b0] sm:$0xff] %v772_v50  ;;  %1285 = vst [vmem:[%s2085_s21 + $0x3b8] sm:$0xff] %v773_v51  ;;  %v802_v47 = vmul.f32 %v2064_v6, %v288_v44  ;;  %v803_v48 = vmul.f32 %v2064_v6, %v289_v45  ;;  %v290_v49 = vld [vmem:[%s2052_s6 + $0x4b0] sm:$0xff]  ;;  %v291_v50 = vld [vmem:[%s2052_s6 + $0x4b8] sm:$0xff] }
  0x7e   : > { %1286 = vst [vmem:[%s2085_s21 + $0x3c0] sm:$0xff] %v774_v55  ;;  %1287 = vst [vmem:[%s2085_s21 + $0x3c8] sm:$0xff] %v775_v56  ;;  %v292_v51 = vld [vmem:[%s2052_s6 + $0x4c0] sm:$0xff]  ;;  %v804_v52 = vmul.f32 %v2064_v6, %v290_v49  ;;  %v805_v53 = vmul.f32 %v2064_v6, %v291_v50  ;;  %v293_v55 = vld [vmem:[%s2052_s6 + $0x4c8] sm:$0xff] }
  0x7f   : > { %1288 = vst [vmem:[%s2085_s21 + $0x3d0] sm:$0xff] %v776_v57  ;;  %1289 = vst [vmem:[%s2085_s21 + $0x3d8] sm:$0xff] %v777_v61  ;;  %v806_v54 = vmul.f32 %v2064_v6, %v292_v51  ;;  %v294_v56 = vld [vmem:[%s2052_s6 + $0x4d0] sm:$0xff]  ;;  %v295_v57 = vld [vmem:[%s2052_s6 + $0x4d8] sm:$0xff]  ;;  %v807_v58 = vmul.f32 %v2064_v6, %v293_v55 }
  0x80   : > { %1290 = vst [vmem:[%s2085_s21 + $0x3e0] sm:$0xff] %v778_v62  ;;  %1291 = vst [vmem:[%s2085_s21 + $0x3e8] sm:$0xff] %v779_v63  ;;  %v808_v59 = vmul.f32 %v2064_v6, %v294_v56  ;;  %v809_v60 = vmul.f32 %v2064_v6, %v295_v57  ;;  %v296_v61 = vld [vmem:[%s2052_s6 + $0x4e0] sm:$0xff]  ;;  %v297_v62 = vld [vmem:[%s2052_s6 + $0x4e8] sm:$0xff] }
  0x81   : > { %1292 = vst [vmem:[%s2085_s21 + $0x3f0] sm:$0xff] %v780_v3  ;;  %1293 = vst [vmem:[%s2085_s21 + $0x3f8] sm:$0xff] %v781_v4  ;;  %v298_v63 = vld [vmem:[%s2052_s6 + $0x4f0] sm:$0xff]  ;;  %v810_v0 = vmul.f32 %v2064_v6, %v296_v61  ;;  %v811_v1 = vmul.f32 %v2064_v6, %v297_v62  ;;  %v299_v3 = vld [vmem:[%s2052_s6 + $0x4f8] sm:$0xff] }
  0x82   : > { %1294 = vst [vmem:[%s2085_s21 + $0x400] sm:$0xff] %v782_v5  ;;  %1295 = vst [vmem:[%s2085_s21 + $0x408] sm:$0xff] %v783_v10  ;;  %v812_v2 = vmul.f32 %v2064_v6, %v298_v63  ;;  %v300_v4 = vld [vmem:[%s2052_s6 + $0x500] sm:$0xff]  ;;  %v301_v5 = vld [vmem:[%s2052_s6 + $0x508] sm:$0xff]  ;;  %v813_v7 = vmul.f32 %v2064_v6, %v299_v3 }
  0x83   : > { %1296 = vst [vmem:[%s2085_s21 + $0x410] sm:$0xff] %v784_v11  ;;  %1297 = vst [vmem:[%s2085_s21 + $0x418] sm:$0xff] %v785_v12  ;;  %v814_v8 = vmul.f32 %v2064_v6, %v300_v4  ;;  %v815_v9 = vmul.f32 %v2064_v6, %v301_v5  ;;  %v302_v10 = vld [vmem:[%s2052_s6 + $0x510] sm:$0xff]  ;;  %v303_v11 = vld [vmem:[%s2052_s6 + $0x518] sm:$0xff] }
  0x84   : > { %1298 = vst [vmem:[%s2085_s21 + $0x420] sm:$0xff] %v786_v16  ;;  %1299 = vst [vmem:[%s2085_s21 + $0x428] sm:$0xff] %v787_v17  ;;  %v304_v12 = vld [vmem:[%s2052_s6 + $0x520] sm:$0xff]  ;;  %v816_v13 = vmul.f32 %v2064_v6, %v302_v10  ;;  %v817_v14 = vmul.f32 %v2064_v6, %v303_v11  ;;  %v305_v16 = vld [vmem:[%s2052_s6 + $0x528] sm:$0xff] }
  0x85   : > { %1300 = vst [vmem:[%s2085_s21 + $0x430] sm:$0xff] %v788_v18  ;;  %1301 = vst [vmem:[%s2085_s21 + $0x438] sm:$0xff] %v789_v22  ;;  %v818_v15 = vmul.f32 %v2064_v6, %v304_v12  ;;  %v306_v17 = vld [vmem:[%s2052_s6 + $0x530] sm:$0xff]  ;;  %v307_v18 = vld [vmem:[%s2052_s6 + $0x538] sm:$0xff]  ;;  %v819_v19 = vmul.f32 %v2064_v6, %v305_v16 }
  0x86   : > { %1302 = vst [vmem:[%s2085_s21 + $0x440] sm:$0xff] %v790_v23  ;;  %1303 = vst [vmem:[%s2085_s21 + $0x448] sm:$0xff] %v791_v24  ;;  %v820_v20 = vmul.f32 %v2064_v6, %v306_v17  ;;  %v821_v21 = vmul.f32 %v2064_v6, %v307_v18  ;;  %v308_v22 = vld [vmem:[%s2052_s6 + $0x540] sm:$0xff]  ;;  %v309_v23 = vld [vmem:[%s2052_s6 + $0x548] sm:$0xff] }
  0x87   : > { %1304 = vst [vmem:[%s2085_s21 + $0x450] sm:$0xff] %v792_v28  ;;  %1305 = vst [vmem:[%s2085_s21 + $0x458] sm:$0xff] %v793_v29  ;;  %v310_v24 = vld [vmem:[%s2052_s6 + $0x550] sm:$0xff]  ;;  %v822_v25 = vmul.f32 %v2064_v6, %v308_v22  ;;  %v823_v26 = vmul.f32 %v2064_v6, %v309_v23  ;;  %v311_v28 = vld [vmem:[%s2052_s6 + $0x558] sm:$0xff] }
  0x88   : > { %1306 = vst [vmem:[%s2085_s21 + $0x460] sm:$0xff] %v794_v30  ;;  %1307 = vst [vmem:[%s2085_s21 + $0x468] sm:$0xff] %v795_v34  ;;  %v824_v27 = vmul.f32 %v2064_v6, %v310_v24  ;;  %v312_v29 = vld [vmem:[%s2052_s6 + $0x560] sm:$0xff]  ;;  %v313_v30 = vld [vmem:[%s2052_s6 + $0x568] sm:$0xff]  ;;  %v825_v31 = vmul.f32 %v2064_v6, %v311_v28 }
  0x89   : > { %1308 = vst [vmem:[%s2085_s21 + $0x470] sm:$0xff] %v796_v35  ;;  %1309 = vst [vmem:[%s2085_s21 + $0x478] sm:$0xff] %v797_v36  ;;  %v826_v32 = vmul.f32 %v2064_v6, %v312_v29  ;;  %v827_v33 = vmul.f32 %v2064_v6, %v313_v30  ;;  %v314_v34 = vld [vmem:[%s2052_s6 + $0x570] sm:$0xff]  ;;  %v315_v35 = vld [vmem:[%s2052_s6 + $0x578] sm:$0xff] }
  0x8a   : > { %1310 = vst [vmem:[%s2085_s21 + $0x480] sm:$0xff] %v798_v40  ;;  %1311 = vst [vmem:[%s2085_s21 + $0x488] sm:$0xff] %v799_v41  ;;  %v316_v36 = vld [vmem:[%s2052_s6 + $0x580] sm:$0xff]  ;;  %v828_v37 = vmul.f32 %v2064_v6, %v314_v34  ;;  %v829_v38 = vmul.f32 %v2064_v6, %v315_v35  ;;  %v317_v40 = vld [vmem:[%s2052_s6 + $0x588] sm:$0xff] }
  0x8b   : > { %1312 = vst [vmem:[%s2085_s21 + $0x490] sm:$0xff] %v800_v42  ;;  %1313 = vst [vmem:[%s2085_s21 + $0x498] sm:$0xff] %v801_v46  ;;  %v830_v39 = vmul.f32 %v2064_v6, %v316_v36  ;;  %v318_v41 = vld [vmem:[%s2052_s6 + $0x590] sm:$0xff]  ;;  %v319_v42 = vld [vmem:[%s2052_s6 + $0x598] sm:$0xff]  ;;  %v831_v43 = vmul.f32 %v2064_v6, %v317_v40 }
  0x8c   : > { %1314 = vst [vmem:[%s2085_s21 + $0x4a0] sm:$0xff] %v802_v47  ;;  %1315 = vst [vmem:[%s2085_s21 + $0x4a8] sm:$0xff] %v803_v48  ;;  %v832_v44 = vmul.f32 %v2064_v6, %v318_v41  ;;  %v833_v45 = vmul.f32 %v2064_v6, %v319_v42  ;;  %v320_v46 = vld [vmem:[%s2052_s6 + $0x5a0] sm:$0xff]  ;;  %v321_v47 = vld [vmem:[%s2052_s6 + $0x5a8] sm:$0xff] }
  0x8d   : > { %1316 = vst [vmem:[%s2085_s21 + $0x4b0] sm:$0xff] %v804_v52  ;;  %1317 = vst [vmem:[%s2085_s21 + $0x4b8] sm:$0xff] %v805_v53  ;;  %v322_v48 = vld [vmem:[%s2052_s6 + $0x5b0] sm:$0xff]  ;;  %v834_v49 = vmul.f32 %v2064_v6, %v320_v46  ;;  %v835_v50 = vmul.f32 %v2064_v6, %v321_v47  ;;  %v323_v52 = vld [vmem:[%s2052_s6 + $0x5b8] sm:$0xff] }
  0x8e   : > { %1318 = vst [vmem:[%s2085_s21 + $0x4c0] sm:$0xff] %v806_v54  ;;  %1319 = vst [vmem:[%s2085_s21 + $0x4c8] sm:$0xff] %v807_v58  ;;  %v836_v51 = vmul.f32 %v2064_v6, %v322_v48  ;;  %v324_v53 = vld [vmem:[%s2052_s6 + $0x5c0] sm:$0xff]  ;;  %v325_v54 = vld [vmem:[%s2052_s6 + $0x5c8] sm:$0xff]  ;;  %v837_v55 = vmul.f32 %v2064_v6, %v323_v52 }
  0x8f   : > { %1320 = vst [vmem:[%s2085_s21 + $0x4d0] sm:$0xff] %v808_v59  ;;  %1321 = vst [vmem:[%s2085_s21 + $0x4d8] sm:$0xff] %v809_v60  ;;  %v838_v56 = vmul.f32 %v2064_v6, %v324_v53  ;;  %v839_v57 = vmul.f32 %v2064_v6, %v325_v54  ;;  %v326_v58 = vld [vmem:[%s2052_s6 + $0x5d0] sm:$0xff]  ;;  %v327_v59 = vld [vmem:[%s2052_s6 + $0x5d8] sm:$0xff] }
  0x90   : > { %1322 = vst [vmem:[%s2085_s21 + $0x4e0] sm:$0xff] %v810_v0  ;;  %1323 = vst [vmem:[%s2085_s21 + $0x4e8] sm:$0xff] %v811_v1  ;;  %v328_v60 = vld [vmem:[%s2052_s6 + $0x5e0] sm:$0xff]  ;;  %v840_v61 = vmul.f32 %v2064_v6, %v326_v58  ;;  %v841_v62 = vmul.f32 %v2064_v6, %v327_v59  ;;  %v329_v0 = vld [vmem:[%s2052_s6 + $0x5e8] sm:$0xff] }
  0x91   : > { %1324 = vst [vmem:[%s2085_s21 + $0x4f0] sm:$0xff] %v812_v2  ;;  %1325 = vst [vmem:[%s2085_s21 + $0x4f8] sm:$0xff] %v813_v7  ;;  %v842_v63 = vmul.f32 %v2064_v6, %v328_v60  ;;  %v330_v1 = vld [vmem:[%s2052_s6 + $0x5f0] sm:$0xff]  ;;  %v331_v2 = vld [vmem:[%s2052_s6 + $0x5f8] sm:$0xff]  ;;  %v843_v3 = vmul.f32 %v2064_v6, %v329_v0 }
  0x92   : > { %1326 = vst [vmem:[%s2085_s21 + $0x500] sm:$0xff] %v814_v8  ;;  %1327 = vst [vmem:[%s2085_s21 + $0x508] sm:$0xff] %v815_v9  ;;  %v844_v4 = vmul.f32 %v2064_v6, %v330_v1  ;;  %v845_v5 = vmul.f32 %v2064_v6, %v331_v2  ;;  %v332_v7 = vld [vmem:[%s2052_s6 + $0x600] sm:$0xff]  ;;  %v333_v8 = vld [vmem:[%s2052_s6 + $0x608] sm:$0xff] }
  0x93   : > { %1328 = vst [vmem:[%s2085_s21 + $0x510] sm:$0xff] %v816_v13  ;;  %1329 = vst [vmem:[%s2085_s21 + $0x518] sm:$0xff] %v817_v14  ;;  %v334_v9 = vld [vmem:[%s2052_s6 + $0x610] sm:$0xff]  ;;  %v846_v10 = vmul.f32 %v2064_v6, %v332_v7  ;;  %v847_v11 = vmul.f32 %v2064_v6, %v333_v8  ;;  %v335_v13 = vld [vmem:[%s2052_s6 + $0x618] sm:$0xff] }
  0x94   : > { %1330 = vst [vmem:[%s2085_s21 + $0x520] sm:$0xff] %v818_v15  ;;  %1331 = vst [vmem:[%s2085_s21 + $0x528] sm:$0xff] %v819_v19  ;;  %v848_v12 = vmul.f32 %v2064_v6, %v334_v9  ;;  %v336_v14 = vld [vmem:[%s2052_s6 + $0x620] sm:$0xff]  ;;  %v337_v15 = vld [vmem:[%s2052_s6 + $0x628] sm:$0xff]  ;;  %v849_v16 = vmul.f32 %v2064_v6, %v335_v13 }
  0x95   : > { %1332 = vst [vmem:[%s2085_s21 + $0x530] sm:$0xff] %v820_v20  ;;  %1333 = vst [vmem:[%s2085_s21 + $0x538] sm:$0xff] %v821_v21  ;;  %v850_v17 = vmul.f32 %v2064_v6, %v336_v14  ;;  %v851_v18 = vmul.f32 %v2064_v6, %v337_v15  ;;  %v338_v19 = vld [vmem:[%s2052_s6 + $0x630] sm:$0xff]  ;;  %v339_v20 = vld [vmem:[%s2052_s6 + $0x638] sm:$0xff] }
  0x96   : > { %1334 = vst [vmem:[%s2085_s21 + $0x540] sm:$0xff] %v822_v25  ;;  %1335 = vst [vmem:[%s2085_s21 + $0x548] sm:$0xff] %v823_v26  ;;  %v340_v21 = vld [vmem:[%s2052_s6 + $0x640] sm:$0xff]  ;;  %v852_v22 = vmul.f32 %v2064_v6, %v338_v19  ;;  %v853_v23 = vmul.f32 %v2064_v6, %v339_v20  ;;  %v341_v25 = vld [vmem:[%s2052_s6 + $0x648] sm:$0xff] }
  0x97   : > { %1336 = vst [vmem:[%s2085_s21 + $0x550] sm:$0xff] %v824_v27  ;;  %1337 = vst [vmem:[%s2085_s21 + $0x558] sm:$0xff] %v825_v31  ;;  %v854_v24 = vmul.f32 %v2064_v6, %v340_v21  ;;  %v342_v26 = vld [vmem:[%s2052_s6 + $0x650] sm:$0xff]  ;;  %v343_v27 = vld [vmem:[%s2052_s6 + $0x658] sm:$0xff]  ;;  %v855_v28 = vmul.f32 %v2064_v6, %v341_v25 }
  0x98   : > { %1338 = vst [vmem:[%s2085_s21 + $0x560] sm:$0xff] %v826_v32  ;;  %1339 = vst [vmem:[%s2085_s21 + $0x568] sm:$0xff] %v827_v33  ;;  %v856_v29 = vmul.f32 %v2064_v6, %v342_v26  ;;  %v857_v30 = vmul.f32 %v2064_v6, %v343_v27  ;;  %v344_v31 = vld [vmem:[%s2052_s6 + $0x660] sm:$0xff]  ;;  %v345_v32 = vld [vmem:[%s2052_s6 + $0x668] sm:$0xff] }
  0x99   : > { %1340 = vst [vmem:[%s2085_s21 + $0x570] sm:$0xff] %v828_v37  ;;  %1341 = vst [vmem:[%s2085_s21 + $0x578] sm:$0xff] %v829_v38  ;;  %v346_v33 = vld [vmem:[%s2052_s6 + $0x670] sm:$0xff]  ;;  %v858_v34 = vmul.f32 %v2064_v6, %v344_v31  ;;  %v859_v35 = vmul.f32 %v2064_v6, %v345_v32  ;;  %v347_v37 = vld [vmem:[%s2052_s6 + $0x678] sm:$0xff] }
  0x9a   : > { %1342 = vst [vmem:[%s2085_s21 + $0x580] sm:$0xff] %v830_v39  ;;  %1343 = vst [vmem:[%s2085_s21 + $0x588] sm:$0xff] %v831_v43  ;;  %v860_v36 = vmul.f32 %v2064_v6, %v346_v33  ;;  %v348_v38 = vld [vmem:[%s2052_s6 + $0x680] sm:$0xff]  ;;  %v349_v39 = vld [vmem:[%s2052_s6 + $0x688] sm:$0xff]  ;;  %v861_v40 = vmul.f32 %v2064_v6, %v347_v37 }
  0x9b   : > { %1344 = vst [vmem:[%s2085_s21 + $0x590] sm:$0xff] %v832_v44  ;;  %1345 = vst [vmem:[%s2085_s21 + $0x598] sm:$0xff] %v833_v45  ;;  %v862_v41 = vmul.f32 %v2064_v6, %v348_v38  ;;  %v863_v42 = vmul.f32 %v2064_v6, %v349_v39  ;;  %v350_v43 = vld [vmem:[%s2052_s6 + $0x690] sm:$0xff]  ;;  %v351_v44 = vld [vmem:[%s2052_s6 + $0x698] sm:$0xff] }
  0x9c   : > { %1346 = vst [vmem:[%s2085_s21 + $0x5a0] sm:$0xff] %v834_v49  ;;  %1347 = vst [vmem:[%s2085_s21 + $0x5a8] sm:$0xff] %v835_v50  ;;  %v352_v45 = vld [vmem:[%s2052_s6 + $0x6a0] sm:$0xff]  ;;  %v864_v46 = vmul.f32 %v2064_v6, %v350_v43  ;;  %v865_v47 = vmul.f32 %v2064_v6, %v351_v44  ;;  %v353_v49 = vld [vmem:[%s2052_s6 + $0x6a8] sm:$0xff] }
  0x9d   : > { %1348 = vst [vmem:[%s2085_s21 + $0x5b0] sm:$0xff] %v836_v51  ;;  %1349 = vst [vmem:[%s2085_s21 + $0x5b8] sm:$0xff] %v837_v55  ;;  %v866_v48 = vmul.f32 %v2064_v6, %v352_v45  ;;  %v354_v50 = vld [vmem:[%s2052_s6 + $0x6b0] sm:$0xff]  ;;  %v355_v51 = vld [vmem:[%s2052_s6 + $0x6b8] sm:$0xff]  ;;  %v867_v52 = vmul.f32 %v2064_v6, %v353_v49 }
  0x9e   : > { %1350 = vst [vmem:[%s2085_s21 + $0x5c0] sm:$0xff] %v838_v56  ;;  %1351 = vst [vmem:[%s2085_s21 + $0x5c8] sm:$0xff] %v839_v57  ;;  %v868_v53 = vmul.f32 %v2064_v6, %v354_v50  ;;  %v869_v54 = vmul.f32 %v2064_v6, %v355_v51  ;;  %v356_v55 = vld [vmem:[%s2052_s6 + $0x6c0] sm:$0xff]  ;;  %v357_v56 = vld [vmem:[%s2052_s6 + $0x6c8] sm:$0xff] }
  0x9f   : > { %1352 = vst [vmem:[%s2085_s21 + $0x5d0] sm:$0xff] %v840_v61  ;;  %1353 = vst [vmem:[%s2085_s21 + $0x5d8] sm:$0xff] %v841_v62  ;;  %v358_v57 = vld [vmem:[%s2052_s6 + $0x6d0] sm:$0xff]  ;;  %v870_v58 = vmul.f32 %v2064_v6, %v356_v55  ;;  %v871_v59 = vmul.f32 %v2064_v6, %v357_v56  ;;  %v359_v61 = vld [vmem:[%s2052_s6 + $0x6d8] sm:$0xff] }
  0xa0   : > { %1354 = vst [vmem:[%s2085_s21 + $0x5e0] sm:$0xff] %v842_v63  ;;  %1355 = vst [vmem:[%s2085_s21 + $0x5e8] sm:$0xff] %v843_v3  ;;  %v872_v60 = vmul.f32 %v2064_v6, %v358_v57  ;;  %v360_v62 = vld [vmem:[%s2052_s6 + $0x6e0] sm:$0xff]  ;;  %v361_v63 = vld [vmem:[%s2052_s6 + $0x6e8] sm:$0xff]  ;;  %v873_v0 = vmul.f32 %v2064_v6, %v359_v61 }
  0xa1   : > { %1356 = vst [vmem:[%s2085_s21 + $0x5f0] sm:$0xff] %v844_v4  ;;  %1357 = vst [vmem:[%s2085_s21 + $0x5f8] sm:$0xff] %v845_v5  ;;  %v874_v1 = vmul.f32 %v2064_v6, %v360_v62  ;;  %v875_v2 = vmul.f32 %v2064_v6, %v361_v63  ;;  %v362_v3 = vld [vmem:[%s2052_s6 + $0x6f0] sm:$0xff]  ;;  %v363_v4 = vld [vmem:[%s2052_s6 + $0x6f8] sm:$0xff] }
  0xa2   : > { %1358 = vst [vmem:[%s2085_s21 + $0x600] sm:$0xff] %v846_v10  ;;  %1359 = vst [vmem:[%s2085_s21 + $0x608] sm:$0xff] %v847_v11  ;;  %v364_v5 = vld [vmem:[%s2052_s6 + $0x700] sm:$0xff]  ;;  %v876_v7 = vmul.f32 %v2064_v6, %v362_v3  ;;  %v877_v8 = vmul.f32 %v2064_v6, %v363_v4  ;;  %v365_v10 = vld [vmem:[%s2052_s6 + $0x708] sm:$0xff] }
  0xa3   : > { %1360 = vst [vmem:[%s2085_s21 + $0x610] sm:$0xff] %v848_v12  ;;  %1361 = vst [vmem:[%s2085_s21 + $0x618] sm:$0xff] %v849_v16  ;;  %v878_v9 = vmul.f32 %v2064_v6, %v364_v5  ;;  %v366_v11 = vld [vmem:[%s2052_s6 + $0x710] sm:$0xff]  ;;  %v367_v12 = vld [vmem:[%s2052_s6 + $0x718] sm:$0xff]  ;;  %v879_v13 = vmul.f32 %v2064_v6, %v365_v10 }
  0xa4   : > { %1362 = vst [vmem:[%s2085_s21 + $0x620] sm:$0xff] %v850_v17  ;;  %1363 = vst [vmem:[%s2085_s21 + $0x628] sm:$0xff] %v851_v18  ;;  %v880_v14 = vmul.f32 %v2064_v6, %v366_v11  ;;  %v881_v15 = vmul.f32 %v2064_v6, %v367_v12  ;;  %v368_v16 = vld [vmem:[%s2052_s6 + $0x720] sm:$0xff]  ;;  %v369_v17 = vld [vmem:[%s2052_s6 + $0x728] sm:$0xff] }
  0xa5   : > { %1364 = vst [vmem:[%s2085_s21 + $0x630] sm:$0xff] %v852_v22  ;;  %1365 = vst [vmem:[%s2085_s21 + $0x638] sm:$0xff] %v853_v23  ;;  %v370_v18 = vld [vmem:[%s2052_s6 + $0x730] sm:$0xff]  ;;  %v882_v19 = vmul.f32 %v2064_v6, %v368_v16  ;;  %v883_v20 = vmul.f32 %v2064_v6, %v369_v17  ;;  %v371_v22 = vld [vmem:[%s2052_s6 + $0x738] sm:$0xff] }
  0xa6   : > { %1366 = vst [vmem:[%s2085_s21 + $0x640] sm:$0xff] %v854_v24  ;;  %1367 = vst [vmem:[%s2085_s21 + $0x648] sm:$0xff] %v855_v28  ;;  %v884_v21 = vmul.f32 %v2064_v6, %v370_v18  ;;  %v372_v23 = vld [vmem:[%s2052_s6 + $0x740] sm:$0xff]  ;;  %v373_v24 = vld [vmem:[%s2052_s6 + $0x748] sm:$0xff]  ;;  %v885_v25 = vmul.f32 %v2064_v6, %v371_v22 }
  0xa7   : > { %1368 = vst [vmem:[%s2085_s21 + $0x650] sm:$0xff] %v856_v29  ;;  %1369 = vst [vmem:[%s2085_s21 + $0x658] sm:$0xff] %v857_v30  ;;  %v886_v26 = vmul.f32 %v2064_v6, %v372_v23  ;;  %v887_v27 = vmul.f32 %v2064_v6, %v373_v24  ;;  %v374_v28 = vld [vmem:[%s2052_s6 + $0x750] sm:$0xff]  ;;  %v375_v29 = vld [vmem:[%s2052_s6 + $0x758] sm:$0xff] }
  0xa8   : > { %1370 = vst [vmem:[%s2085_s21 + $0x660] sm:$0xff] %v858_v34  ;;  %1371 = vst [vmem:[%s2085_s21 + $0x668] sm:$0xff] %v859_v35  ;;  %v376_v30 = vld [vmem:[%s2052_s6 + $0x760] sm:$0xff]  ;;  %v888_v31 = vmul.f32 %v2064_v6, %v374_v28  ;;  %v889_v32 = vmul.f32 %v2064_v6, %v375_v29  ;;  %v377_v34 = vld [vmem:[%s2052_s6 + $0x768] sm:$0xff] }
  0xa9   : > { %1372 = vst [vmem:[%s2085_s21 + $0x670] sm:$0xff] %v860_v36  ;;  %1373 = vst [vmem:[%s2085_s21 + $0x678] sm:$0xff] %v861_v40  ;;  %v890_v33 = vmul.f32 %v2064_v6, %v376_v30  ;;  %v378_v35 = vld [vmem:[%s2052_s6 + $0x770] sm:$0xff]  ;;  %v379_v36 = vld [vmem:[%s2052_s6 + $0x778] sm:$0xff]  ;;  %v891_v37 = vmul.f32 %v2064_v6, %v377_v34 }
  0xaa   : > { %1374 = vst [vmem:[%s2085_s21 + $0x680] sm:$0xff] %v862_v41  ;;  %1375 = vst [vmem:[%s2085_s21 + $0x688] sm:$0xff] %v863_v42  ;;  %v892_v38 = vmul.f32 %v2064_v6, %v378_v35  ;;  %v893_v39 = vmul.f32 %v2064_v6, %v379_v36  ;;  %v380_v40 = vld [vmem:[%s2052_s6 + $0x780] sm:$0xff]  ;;  %v381_v41 = vld [vmem:[%s2052_s6 + $0x788] sm:$0xff] }
  0xab   : > { %1376 = vst [vmem:[%s2085_s21 + $0x690] sm:$0xff] %v864_v46  ;;  %1377 = vst [vmem:[%s2085_s21 + $0x698] sm:$0xff] %v865_v47  ;;  %v382_v42 = vld [vmem:[%s2052_s6 + $0x790] sm:$0xff]  ;;  %v894_v43 = vmul.f32 %v2064_v6, %v380_v40  ;;  %v895_v44 = vmul.f32 %v2064_v6, %v381_v41  ;;  %v383_v46 = vld [vmem:[%s2052_s6 + $0x798] sm:$0xff] }
  0xac   : > { %1378 = vst [vmem:[%s2085_s21 + $0x6a0] sm:$0xff] %v866_v48  ;;  %1379 = vst [vmem:[%s2085_s21 + $0x6a8] sm:$0xff] %v867_v52  ;;  %v896_v45 = vmul.f32 %v2064_v6, %v382_v42  ;;  %v384_v47 = vld [vmem:[%s2052_s6 + $0x7a0] sm:$0xff]  ;;  %v385_v48 = vld [vmem:[%s2052_s6 + $0x7a8] sm:$0xff]  ;;  %v897_v49 = vmul.f32 %v2064_v6, %v383_v46 }
  0xad   : > { %1380 = vst [vmem:[%s2085_s21 + $0x6b0] sm:$0xff] %v868_v53  ;;  %1381 = vst [vmem:[%s2085_s21 + $0x6b8] sm:$0xff] %v869_v54  ;;  %v898_v50 = vmul.f32 %v2064_v6, %v384_v47  ;;  %v899_v51 = vmul.f32 %v2064_v6, %v385_v48  ;;  %v386_v52 = vld [vmem:[%s2052_s6 + $0x7b0] sm:$0xff]  ;;  %v387_v53 = vld [vmem:[%s2052_s6 + $0x7b8] sm:$0xff] }
  0xae   : > { %1382 = vst [vmem:[%s2085_s21 + $0x6c0] sm:$0xff] %v870_v58  ;;  %1383 = vst [vmem:[%s2085_s21 + $0x6c8] sm:$0xff] %v871_v59  ;;  %v388_v54 = vld [vmem:[%s2052_s6 + $0x7c0] sm:$0xff]  ;;  %v900_v55 = vmul.f32 %v2064_v6, %v386_v52  ;;  %v901_v56 = vmul.f32 %v2064_v6, %v387_v53  ;;  %v389_v58 = vld [vmem:[%s2052_s6 + $0x7c8] sm:$0xff] }
  0xaf   : > { %1384 = vst [vmem:[%s2085_s21 + $0x6d0] sm:$0xff] %v872_v60  ;;  %1385 = vst [vmem:[%s2085_s21 + $0x6d8] sm:$0xff] %v873_v0  ;;  %v902_v57 = vmul.f32 %v2064_v6, %v388_v54  ;;  %v390_v59 = vld [vmem:[%s2052_s6 + $0x7d0] sm:$0xff]  ;;  %v391_v60 = vld [vmem:[%s2052_s6 + $0x7d8] sm:$0xff]  ;;  %v903_v61 = vmul.f32 %v2064_v6, %v389_v58 }
  0xb0   : > { %1386 = vst [vmem:[%s2085_s21 + $0x6e0] sm:$0xff] %v874_v1  ;;  %1387 = vst [vmem:[%s2085_s21 + $0x6e8] sm:$0xff] %v875_v2  ;;  %v904_v62 = vmul.f32 %v2064_v6, %v390_v59  ;;  %v905_v63 = vmul.f32 %v2064_v6, %v391_v60  ;;  %v392_v0 = vld [vmem:[%s2052_s6 + $0x7e0] sm:$0xff]  ;;  %v393_v1 = vld [vmem:[%s2052_s6 + $0x7e8] sm:$0xff] }
  0xb1   : > { %1388 = vst [vmem:[%s2085_s21 + $0x6f0] sm:$0xff] %v876_v7  ;;  %1389 = vst [vmem:[%s2085_s21 + $0x6f8] sm:$0xff] %v877_v8  ;;  %v394_v2 = vld [vmem:[%s2052_s6 + $0x7f0] sm:$0xff]  ;;  %v906_v3 = vmul.f32 %v2064_v6, %v392_v0  ;;  %v907_v4 = vmul.f32 %v2064_v6, %v393_v1  ;;  %v395_v7 = vld [vmem:[%s2052_s6 + $0x7f8] sm:$0xff] }
  0xb2   : > { %1390 = vst [vmem:[%s2085_s21 + $0x700] sm:$0xff] %v878_v9  ;;  %1391 = vst [vmem:[%s2085_s21 + $0x708] sm:$0xff] %v879_v13  ;;  %v908_v5 = vmul.f32 %v2064_v6, %v394_v2  ;;  %v396_v8 = vld [vmem:[%s2052_s6 + $0x800] sm:$0xff]  ;;  %v397_v9 = vld [vmem:[%s2052_s6 + $0x808] sm:$0xff]  ;;  %v909_v10 = vmul.f32 %v2064_v6, %v395_v7 }
  0xb3   : > { %1392 = vst [vmem:[%s2085_s21 + $0x710] sm:$0xff] %v880_v14  ;;  %1393 = vst [vmem:[%s2085_s21 + $0x718] sm:$0xff] %v881_v15  ;;  %v910_v11 = vmul.f32 %v2064_v6, %v396_v8  ;;  %v911_v12 = vmul.f32 %v2064_v6, %v397_v9  ;;  %v398_v13 = vld [vmem:[%s2052_s6 + $0x810] sm:$0xff]  ;;  %v399_v14 = vld [vmem:[%s2052_s6 + $0x818] sm:$0xff] }
  0xb4   : > { %1394 = vst [vmem:[%s2085_s21 + $0x720] sm:$0xff] %v882_v19  ;;  %1395 = vst [vmem:[%s2085_s21 + $0x728] sm:$0xff] %v883_v20  ;;  %v400_v15 = vld [vmem:[%s2052_s6 + $0x820] sm:$0xff]  ;;  %v912_v16 = vmul.f32 %v2064_v6, %v398_v13  ;;  %v913_v17 = vmul.f32 %v2064_v6, %v399_v14  ;;  %v401_v19 = vld [vmem:[%s2052_s6 + $0x828] sm:$0xff] }
  0xb5   : > { %1396 = vst [vmem:[%s2085_s21 + $0x730] sm:$0xff] %v884_v21  ;;  %1397 = vst [vmem:[%s2085_s21 + $0x738] sm:$0xff] %v885_v25  ;;  %v914_v18 = vmul.f32 %v2064_v6, %v400_v15  ;;  %v402_v20 = vld [vmem:[%s2052_s6 + $0x830] sm:$0xff]  ;;  %v403_v21 = vld [vmem:[%s2052_s6 + $0x838] sm:$0xff]  ;;  %v915_v22 = vmul.f32 %v2064_v6, %v401_v19 }
  0xb6   : > { %1398 = vst [vmem:[%s2085_s21 + $0x740] sm:$0xff] %v886_v26  ;;  %1399 = vst [vmem:[%s2085_s21 + $0x748] sm:$0xff] %v887_v27  ;;  %v916_v23 = vmul.f32 %v2064_v6, %v402_v20  ;;  %v917_v24 = vmul.f32 %v2064_v6, %v403_v21  ;;  %v404_v25 = vld [vmem:[%s2052_s6 + $0x840] sm:$0xff]  ;;  %v405_v26 = vld [vmem:[%s2052_s6 + $0x848] sm:$0xff] }
  0xb7   : > { %1400 = vst [vmem:[%s2085_s21 + $0x750] sm:$0xff] %v888_v31  ;;  %1401 = vst [vmem:[%s2085_s21 + $0x758] sm:$0xff] %v889_v32  ;;  %v406_v27 = vld [vmem:[%s2052_s6 + $0x850] sm:$0xff]  ;;  %v918_v28 = vmul.f32 %v2064_v6, %v404_v25  ;;  %v919_v29 = vmul.f32 %v2064_v6, %v405_v26  ;;  %v407_v31 = vld [vmem:[%s2052_s6 + $0x858] sm:$0xff] }
  0xb8   : > { %1402 = vst [vmem:[%s2085_s21 + $0x760] sm:$0xff] %v890_v33  ;;  %1403 = vst [vmem:[%s2085_s21 + $0x768] sm:$0xff] %v891_v37  ;;  %v920_v30 = vmul.f32 %v2064_v6, %v406_v27  ;;  %v408_v32 = vld [vmem:[%s2052_s6 + $0x860] sm:$0xff]  ;;  %v409_v33 = vld [vmem:[%s2052_s6 + $0x868] sm:$0xff]  ;;  %v921_v34 = vmul.f32 %v2064_v6, %v407_v31 }
  0xb9   : > { %1404 = vst [vmem:[%s2085_s21 + $0x770] sm:$0xff] %v892_v38  ;;  %1405 = vst [vmem:[%s2085_s21 + $0x778] sm:$0xff] %v893_v39  ;;  %v922_v35 = vmul.f32 %v2064_v6, %v408_v32  ;;  %v923_v36 = vmul.f32 %v2064_v6, %v409_v33  ;;  %v410_v37 = vld [vmem:[%s2052_s6 + $0x870] sm:$0xff]  ;;  %v411_v38 = vld [vmem:[%s2052_s6 + $0x878] sm:$0xff] }
  0xba   : > { %1406 = vst [vmem:[%s2085_s21 + $0x780] sm:$0xff] %v894_v43  ;;  %1407 = vst [vmem:[%s2085_s21 + $0x788] sm:$0xff] %v895_v44  ;;  %v412_v39 = vld [vmem:[%s2052_s6 + $0x880] sm:$0xff]  ;;  %v924_v40 = vmul.f32 %v2064_v6, %v410_v37  ;;  %v925_v41 = vmul.f32 %v2064_v6, %v411_v38  ;;  %v413_v43 = vld [vmem:[%s2052_s6 + $0x888] sm:$0xff] }
  0xbb   : > { %1408 = vst [vmem:[%s2085_s21 + $0x790] sm:$0xff] %v896_v45  ;;  %1409 = vst [vmem:[%s2085_s21 + $0x798] sm:$0xff] %v897_v49  ;;  %v926_v42 = vmul.f32 %v2064_v6, %v412_v39  ;;  %v414_v44 = vld [vmem:[%s2052_s6 + $0x890] sm:$0xff]  ;;  %v415_v45 = vld [vmem:[%s2052_s6 + $0x898] sm:$0xff]  ;;  %v927_v46 = vmul.f32 %v2064_v6, %v413_v43 }
  0xbc   : > { %1410 = vst [vmem:[%s2085_s21 + $0x7a0] sm:$0xff] %v898_v50  ;;  %1411 = vst [vmem:[%s2085_s21 + $0x7a8] sm:$0xff] %v899_v51  ;;  %v928_v47 = vmul.f32 %v2064_v6, %v414_v44  ;;  %v929_v48 = vmul.f32 %v2064_v6, %v415_v45  ;;  %v416_v49 = vld [vmem:[%s2052_s6 + $0x8a0] sm:$0xff]  ;;  %v417_v50 = vld [vmem:[%s2052_s6 + $0x8a8] sm:$0xff] }
  0xbd   : > { %1412 = vst [vmem:[%s2085_s21 + $0x7b0] sm:$0xff] %v900_v55  ;;  %1413 = vst [vmem:[%s2085_s21 + $0x7b8] sm:$0xff] %v901_v56  ;;  %v418_v51 = vld [vmem:[%s2052_s6 + $0x8b0] sm:$0xff]  ;;  %v930_v52 = vmul.f32 %v2064_v6, %v416_v49  ;;  %v931_v53 = vmul.f32 %v2064_v6, %v417_v50  ;;  %v419_v55 = vld [vmem:[%s2052_s6 + $0x8b8] sm:$0xff] }
  0xbe   : > { %1414 = vst [vmem:[%s2085_s21 + $0x7c0] sm:$0xff] %v902_v57  ;;  %1415 = vst [vmem:[%s2085_s21 + $0x7c8] sm:$0xff] %v903_v61  ;;  %v932_v54 = vmul.f32 %v2064_v6, %v418_v51  ;;  %v420_v56 = vld [vmem:[%s2052_s6 + $0x8c0] sm:$0xff]  ;;  %v421_v57 = vld [vmem:[%s2052_s6 + $0x8c8] sm:$0xff]  ;;  %v933_v58 = vmul.f32 %v2064_v6, %v419_v55 }
  0xbf   : > { %1416 = vst [vmem:[%s2085_s21 + $0x7d0] sm:$0xff] %v904_v62  ;;  %1417 = vst [vmem:[%s2085_s21 + $0x7d8] sm:$0xff] %v905_v63  ;;  %v934_v59 = vmul.f32 %v2064_v6, %v420_v56  ;;  %v935_v60 = vmul.f32 %v2064_v6, %v421_v57  ;;  %v422_v61 = vld [vmem:[%s2052_s6 + $0x8d0] sm:$0xff]  ;;  %v423_v62 = vld [vmem:[%s2052_s6 + $0x8d8] sm:$0xff] }
  0xc0   : > { %1418 = vst [vmem:[%s2085_s21 + $0x7e0] sm:$0xff] %v906_v3  ;;  %1419 = vst [vmem:[%s2085_s21 + $0x7e8] sm:$0xff] %v907_v4  ;;  %v424_v63 = vld [vmem:[%s2052_s6 + $0x8e0] sm:$0xff]  ;;  %v936_v0 = vmul.f32 %v2064_v6, %v422_v61  ;;  %v937_v1 = vmul.f32 %v2064_v6, %v423_v62  ;;  %v425_v3 = vld [vmem:[%s2052_s6 + $0x8e8] sm:$0xff] }
  0xc1   : > { %1420 = vst [vmem:[%s2085_s21 + $0x7f0] sm:$0xff] %v908_v5  ;;  %1421 = vst [vmem:[%s2085_s21 + $0x7f8] sm:$0xff] %v909_v10  ;;  %v938_v2 = vmul.f32 %v2064_v6, %v424_v63  ;;  %v426_v4 = vld [vmem:[%s2052_s6 + $0x8f0] sm:$0xff]  ;;  %v427_v5 = vld [vmem:[%s2052_s6 + $0x8f8] sm:$0xff]  ;;  %v939_v7 = vmul.f32 %v2064_v6, %v425_v3 }
  0xc2   : > { %1422 = vst [vmem:[%s2085_s21 + $0x800] sm:$0xff] %v910_v11  ;;  %1423 = vst [vmem:[%s2085_s21 + $0x808] sm:$0xff] %v911_v12  ;;  %v940_v8 = vmul.f32 %v2064_v6, %v426_v4  ;;  %v941_v9 = vmul.f32 %v2064_v6, %v427_v5  ;;  %v428_v10 = vld [vmem:[%s2052_s6 + $0x900] sm:$0xff]  ;;  %v429_v11 = vld [vmem:[%s2052_s6 + $0x908] sm:$0xff] }
  0xc3   : > { %1424 = vst [vmem:[%s2085_s21 + $0x810] sm:$0xff] %v912_v16  ;;  %1425 = vst [vmem:[%s2085_s21 + $0x818] sm:$0xff] %v913_v17  ;;  %v430_v12 = vld [vmem:[%s2052_s6 + $0x910] sm:$0xff]  ;;  %v942_v13 = vmul.f32 %v2064_v6, %v428_v10  ;;  %v943_v14 = vmul.f32 %v2064_v6, %v429_v11  ;;  %v431_v16 = vld [vmem:[%s2052_s6 + $0x918] sm:$0xff] }
  0xc4   : > { %1426 = vst [vmem:[%s2085_s21 + $0x820] sm:$0xff] %v914_v18  ;;  %1427 = vst [vmem:[%s2085_s21 + $0x828] sm:$0xff] %v915_v22  ;;  %v944_v15 = vmul.f32 %v2064_v6, %v430_v12  ;;  %v432_v17 = vld [vmem:[%s2052_s6 + $0x920] sm:$0xff]  ;;  %v433_v18 = vld [vmem:[%s2052_s6 + $0x928] sm:$0xff]  ;;  %v945_v19 = vmul.f32 %v2064_v6, %v431_v16 }
  0xc5   : > { %1428 = vst [vmem:[%s2085_s21 + $0x830] sm:$0xff] %v916_v23  ;;  %1429 = vst [vmem:[%s2085_s21 + $0x838] sm:$0xff] %v917_v24  ;;  %v946_v20 = vmul.f32 %v2064_v6, %v432_v17  ;;  %v947_v21 = vmul.f32 %v2064_v6, %v433_v18  ;;  %v434_v22 = vld [vmem:[%s2052_s6 + $0x930] sm:$0xff]  ;;  %v435_v23 = vld [vmem:[%s2052_s6 + $0x938] sm:$0xff] }
  0xc6   : > { %1430 = vst [vmem:[%s2085_s21 + $0x840] sm:$0xff] %v918_v28  ;;  %1431 = vst [vmem:[%s2085_s21 + $0x848] sm:$0xff] %v919_v29  ;;  %v436_v24 = vld [vmem:[%s2052_s6 + $0x940] sm:$0xff]  ;;  %v948_v25 = vmul.f32 %v2064_v6, %v434_v22  ;;  %v949_v26 = vmul.f32 %v2064_v6, %v435_v23  ;;  %v437_v28 = vld [vmem:[%s2052_s6 + $0x948] sm:$0xff] }
  0xc7   : > { %1432 = vst [vmem:[%s2085_s21 + $0x850] sm:$0xff] %v920_v30  ;;  %1433 = vst [vmem:[%s2085_s21 + $0x858] sm:$0xff] %v921_v34  ;;  %v950_v27 = vmul.f32 %v2064_v6, %v436_v24  ;;  %v438_v29 = vld [vmem:[%s2052_s6 + $0x950] sm:$0xff]  ;;  %v439_v30 = vld [vmem:[%s2052_s6 + $0x958] sm:$0xff]  ;;  %v951_v31 = vmul.f32 %v2064_v6, %v437_v28 }
  0xc8   : > { %1434 = vst [vmem:[%s2085_s21 + $0x860] sm:$0xff] %v922_v35  ;;  %1435 = vst [vmem:[%s2085_s21 + $0x868] sm:$0xff] %v923_v36  ;;  %v952_v32 = vmul.f32 %v2064_v6, %v438_v29  ;;  %v953_v33 = vmul.f32 %v2064_v6, %v439_v30  ;;  %v440_v34 = vld [vmem:[%s2052_s6 + $0x960] sm:$0xff]  ;;  %v441_v35 = vld [vmem:[%s2052_s6 + $0x968] sm:$0xff] }
  0xc9   : > { %1436 = vst [vmem:[%s2085_s21 + $0x870] sm:$0xff] %v924_v40  ;;  %1437 = vst [vmem:[%s2085_s21 + $0x878] sm:$0xff] %v925_v41  ;;  %v442_v36 = vld [vmem:[%s2052_s6 + $0x970] sm:$0xff]  ;;  %v954_v37 = vmul.f32 %v2064_v6, %v440_v34  ;;  %v955_v38 = vmul.f32 %v2064_v6, %v441_v35  ;;  %v443_v40 = vld [vmem:[%s2052_s6 + $0x978] sm:$0xff] }
  0xca   : > { %1438 = vst [vmem:[%s2085_s21 + $0x880] sm:$0xff] %v926_v42  ;;  %1439 = vst [vmem:[%s2085_s21 + $0x888] sm:$0xff] %v927_v46  ;;  %v956_v39 = vmul.f32 %v2064_v6, %v442_v36  ;;  %v444_v41 = vld [vmem:[%s2052_s6 + $0x980] sm:$0xff]  ;;  %v445_v42 = vld [vmem:[%s2052_s6 + $0x988] sm:$0xff]  ;;  %v957_v43 = vmul.f32 %v2064_v6, %v443_v40 }
  0xcb   : > { %1440 = vst [vmem:[%s2085_s21 + $0x890] sm:$0xff] %v928_v47  ;;  %1441 = vst [vmem:[%s2085_s21 + $0x898] sm:$0xff] %v929_v48  ;;  %v958_v44 = vmul.f32 %v2064_v6, %v444_v41  ;;  %v959_v45 = vmul.f32 %v2064_v6, %v445_v42  ;;  %v446_v46 = vld [vmem:[%s2052_s6 + $0x990] sm:$0xff]  ;;  %v447_v47 = vld [vmem:[%s2052_s6 + $0x998] sm:$0xff] }
  0xcc   : > { %1442 = vst [vmem:[%s2085_s21 + $0x8a0] sm:$0xff] %v930_v52  ;;  %1443 = vst [vmem:[%s2085_s21 + $0x8a8] sm:$0xff] %v931_v53  ;;  %v448_v48 = vld [vmem:[%s2052_s6 + $0x9a0] sm:$0xff]  ;;  %v960_v49 = vmul.f32 %v2064_v6, %v446_v46  ;;  %v961_v50 = vmul.f32 %v2064_v6, %v447_v47  ;;  %v449_v52 = vld [vmem:[%s2052_s6 + $0x9a8] sm:$0xff] }
  0xcd   : > { %1444 = vst [vmem:[%s2085_s21 + $0x8b0] sm:$0xff] %v932_v54  ;;  %1445 = vst [vmem:[%s2085_s21 + $0x8b8] sm:$0xff] %v933_v58  ;;  %v962_v51 = vmul.f32 %v2064_v6, %v448_v48  ;;  %v450_v53 = vld [vmem:[%s2052_s6 + $0x9b0] sm:$0xff]  ;;  %v451_v54 = vld [vmem:[%s2052_s6 + $0x9b8] sm:$0xff]  ;;  %v963_v55 = vmul.f32 %v2064_v6, %v449_v52 }
  0xce   : > { %1446 = vst [vmem:[%s2085_s21 + $0x8c0] sm:$0xff] %v934_v59  ;;  %1447 = vst [vmem:[%s2085_s21 + $0x8c8] sm:$0xff] %v935_v60  ;;  %v964_v56 = vmul.f32 %v2064_v6, %v450_v53  ;;  %v965_v57 = vmul.f32 %v2064_v6, %v451_v54  ;;  %v452_v58 = vld [vmem:[%s2052_s6 + $0x9c0] sm:$0xff]  ;;  %v453_v59 = vld [vmem:[%s2052_s6 + $0x9c8] sm:$0xff] }
  0xcf   : > { %1448 = vst [vmem:[%s2085_s21 + $0x8d0] sm:$0xff] %v936_v0  ;;  %1449 = vst [vmem:[%s2085_s21 + $0x8d8] sm:$0xff] %v937_v1  ;;  %v454_v60 = vld [vmem:[%s2052_s6 + $0x9d0] sm:$0xff]  ;;  %v966_v61 = vmul.f32 %v2064_v6, %v452_v58  ;;  %v967_v62 = vmul.f32 %v2064_v6, %v453_v59  ;;  %v455_v0 = vld [vmem:[%s2052_s6 + $0x9d8] sm:$0xff] }
  0xd0   : > { %1450 = vst [vmem:[%s2085_s21 + $0x8e0] sm:$0xff] %v938_v2  ;;  %1451 = vst [vmem:[%s2085_s21 + $0x8e8] sm:$0xff] %v939_v7  ;;  %v968_v63 = vmul.f32 %v2064_v6, %v454_v60  ;;  %v456_v1 = vld [vmem:[%s2052_s6 + $0x9e0] sm:$0xff]  ;;  %v457_v2 = vld [vmem:[%s2052_s6 + $0x9e8] sm:$0xff]  ;;  %v969_v3 = vmul.f32 %v2064_v6, %v455_v0 }
  0xd1   : > { %1452 = vst [vmem:[%s2085_s21 + $0x8f0] sm:$0xff] %v940_v8  ;;  %1453 = vst [vmem:[%s2085_s21 + $0x8f8] sm:$0xff] %v941_v9  ;;  %v970_v4 = vmul.f32 %v2064_v6, %v456_v1  ;;  %v971_v5 = vmul.f32 %v2064_v6, %v457_v2  ;;  %v458_v7 = vld [vmem:[%s2052_s6 + $0x9f0] sm:$0xff]  ;;  %v459_v8 = vld [vmem:[%s2052_s6 + $0x9f8] sm:$0xff] }
  0xd2   : > { %1454 = vst [vmem:[%s2085_s21 + $0x900] sm:$0xff] %v942_v13  ;;  %1455 = vst [vmem:[%s2085_s21 + $0x908] sm:$0xff] %v943_v14  ;;  %v460_v9 = vld [vmem:[%s2052_s6 + $0xa00] sm:$0xff]  ;;  %v972_v10 = vmul.f32 %v2064_v6, %v458_v7  ;;  %v973_v11 = vmul.f32 %v2064_v6, %v459_v8  ;;  %v461_v13 = vld [vmem:[%s2052_s6 + $0xa08] sm:$0xff] }
  0xd3   : > { %1456 = vst [vmem:[%s2085_s21 + $0x910] sm:$0xff] %v944_v15  ;;  %1457 = vst [vmem:[%s2085_s21 + $0x918] sm:$0xff] %v945_v19  ;;  %v974_v12 = vmul.f32 %v2064_v6, %v460_v9  ;;  %v462_v14 = vld [vmem:[%s2052_s6 + $0xa10] sm:$0xff]  ;;  %v463_v15 = vld [vmem:[%s2052_s6 + $0xa18] sm:$0xff]  ;;  %v975_v16 = vmul.f32 %v2064_v6, %v461_v13 }
  0xd4   : > { %1458 = vst [vmem:[%s2085_s21 + $0x920] sm:$0xff] %v946_v20  ;;  %1459 = vst [vmem:[%s2085_s21 + $0x928] sm:$0xff] %v947_v21  ;;  %v976_v17 = vmul.f32 %v2064_v6, %v462_v14  ;;  %v977_v18 = vmul.f32 %v2064_v6, %v463_v15  ;;  %v464_v19 = vld [vmem:[%s2052_s6 + $0xa20] sm:$0xff]  ;;  %v465_v20 = vld [vmem:[%s2052_s6 + $0xa28] sm:$0xff] }
  0xd5   : > { %1460 = vst [vmem:[%s2085_s21 + $0x930] sm:$0xff] %v948_v25  ;;  %1461 = vst [vmem:[%s2085_s21 + $0x938] sm:$0xff] %v949_v26  ;;  %v466_v21 = vld [vmem:[%s2052_s6 + $0xa30] sm:$0xff]  ;;  %v978_v22 = vmul.f32 %v2064_v6, %v464_v19  ;;  %v979_v23 = vmul.f32 %v2064_v6, %v465_v20  ;;  %v467_v25 = vld [vmem:[%s2052_s6 + $0xa38] sm:$0xff] }
  0xd6   : > { %1462 = vst [vmem:[%s2085_s21 + $0x940] sm:$0xff] %v950_v27  ;;  %1463 = vst [vmem:[%s2085_s21 + $0x948] sm:$0xff] %v951_v31  ;;  %v980_v24 = vmul.f32 %v2064_v6, %v466_v21  ;;  %v468_v26 = vld [vmem:[%s2052_s6 + $0xa40] sm:$0xff]  ;;  %v469_v27 = vld [vmem:[%s2052_s6 + $0xa48] sm:$0xff]  ;;  %v981_v28 = vmul.f32 %v2064_v6, %v467_v25 }
  0xd7   : > { %1464 = vst [vmem:[%s2085_s21 + $0x950] sm:$0xff] %v952_v32  ;;  %1465 = vst [vmem:[%s2085_s21 + $0x958] sm:$0xff] %v953_v33  ;;  %v982_v29 = vmul.f32 %v2064_v6, %v468_v26  ;;  %v983_v30 = vmul.f32 %v2064_v6, %v469_v27  ;;  %v470_v31 = vld [vmem:[%s2052_s6 + $0xa50] sm:$0xff]  ;;  %v471_v32 = vld [vmem:[%s2052_s6 + $0xa58] sm:$0xff] }
  0xd8   : > { %1466 = vst [vmem:[%s2085_s21 + $0x960] sm:$0xff] %v954_v37  ;;  %1467 = vst [vmem:[%s2085_s21 + $0x968] sm:$0xff] %v955_v38  ;;  %v472_v33 = vld [vmem:[%s2052_s6 + $0xa60] sm:$0xff]  ;;  %v984_v34 = vmul.f32 %v2064_v6, %v470_v31  ;;  %v985_v35 = vmul.f32 %v2064_v6, %v471_v32  ;;  %v473_v37 = vld [vmem:[%s2052_s6 + $0xa68] sm:$0xff] }
  0xd9   : > { %1468 = vst [vmem:[%s2085_s21 + $0x970] sm:$0xff] %v956_v39  ;;  %1469 = vst [vmem:[%s2085_s21 + $0x978] sm:$0xff] %v957_v43  ;;  %v986_v36 = vmul.f32 %v2064_v6, %v472_v33  ;;  %v474_v38 = vld [vmem:[%s2052_s6 + $0xa70] sm:$0xff]  ;;  %v475_v39 = vld [vmem:[%s2052_s6 + $0xa78] sm:$0xff]  ;;  %v987_v40 = vmul.f32 %v2064_v6, %v473_v37 }
  0xda   : > { %1470 = vst [vmem:[%s2085_s21 + $0x980] sm:$0xff] %v958_v44  ;;  %1471 = vst [vmem:[%s2085_s21 + $0x988] sm:$0xff] %v959_v45  ;;  %v988_v41 = vmul.f32 %v2064_v6, %v474_v38  ;;  %v989_v42 = vmul.f32 %v2064_v6, %v475_v39  ;;  %v476_v43 = vld [vmem:[%s2052_s6 + $0xa80] sm:$0xff]  ;;  %v477_v44 = vld [vmem:[%s2052_s6 + $0xa88] sm:$0xff] }
  0xdb   : > { %1472 = vst [vmem:[%s2085_s21 + $0x990] sm:$0xff] %v960_v49  ;;  %1473 = vst [vmem:[%s2085_s21 + $0x998] sm:$0xff] %v961_v50  ;;  %v478_v45 = vld [vmem:[%s2052_s6 + $0xa90] sm:$0xff]  ;;  %v990_v46 = vmul.f32 %v2064_v6, %v476_v43  ;;  %v991_v47 = vmul.f32 %v2064_v6, %v477_v44  ;;  %v479_v49 = vld [vmem:[%s2052_s6 + $0xa98] sm:$0xff] }
  0xdc   : > { %1474 = vst [vmem:[%s2085_s21 + $0x9a0] sm:$0xff] %v962_v51  ;;  %1475 = vst [vmem:[%s2085_s21 + $0x9a8] sm:$0xff] %v963_v55  ;;  %v992_v48 = vmul.f32 %v2064_v6, %v478_v45  ;;  %v480_v50 = vld [vmem:[%s2052_s6 + $0xaa0] sm:$0xff]  ;;  %v481_v51 = vld [vmem:[%s2052_s6 + $0xaa8] sm:$0xff]  ;;  %v993_v52 = vmul.f32 %v2064_v6, %v479_v49 }
  0xdd   : > { %1476 = vst [vmem:[%s2085_s21 + $0x9b0] sm:$0xff] %v964_v56  ;;  %1477 = vst [vmem:[%s2085_s21 + $0x9b8] sm:$0xff] %v965_v57  ;;  %v994_v53 = vmul.f32 %v2064_v6, %v480_v50  ;;  %v995_v54 = vmul.f32 %v2064_v6, %v481_v51  ;;  %v482_v55 = vld [vmem:[%s2052_s6 + $0xab0] sm:$0xff]  ;;  %v483_v56 = vld [vmem:[%s2052_s6 + $0xab8] sm:$0xff] }
  0xde   : > { %1478 = vst [vmem:[%s2085_s21 + $0x9c0] sm:$0xff] %v966_v61  ;;  %1479 = vst [vmem:[%s2085_s21 + $0x9c8] sm:$0xff] %v967_v62  ;;  %v484_v57 = vld [vmem:[%s2052_s6 + $0xac0] sm:$0xff]  ;;  %v996_v58 = vmul.f32 %v2064_v6, %v482_v55  ;;  %v997_v59 = vmul.f32 %v2064_v6, %v483_v56  ;;  %v485_v61 = vld [vmem:[%s2052_s6 + $0xac8] sm:$0xff] }
  0xdf   : > { %1480 = vst [vmem:[%s2085_s21 + $0x9d0] sm:$0xff] %v968_v63  ;;  %1481 = vst [vmem:[%s2085_s21 + $0x9d8] sm:$0xff] %v969_v3  ;;  %v998_v60 = vmul.f32 %v2064_v6, %v484_v57  ;;  %v486_v62 = vld [vmem:[%s2052_s6 + $0xad0] sm:$0xff]  ;;  %v487_v63 = vld [vmem:[%s2052_s6 + $0xad8] sm:$0xff]  ;;  %v999_v0 = vmul.f32 %v2064_v6, %v485_v61 }
  0xe0   : > { %1482 = vst [vmem:[%s2085_s21 + $0x9e0] sm:$0xff] %v970_v4  ;;  %1483 = vst [vmem:[%s2085_s21 + $0x9e8] sm:$0xff] %v971_v5  ;;  %v1000_v1 = vmul.f32 %v2064_v6, %v486_v62  ;;  %v1001_v2 = vmul.f32 %v2064_v6, %v487_v63  ;;  %v488_v3 = vld [vmem:[%s2052_s6 + $0xae0] sm:$0xff]  ;;  %v489_v4 = vld [vmem:[%s2052_s6 + $0xae8] sm:$0xff] }
  0xe1   : > { %1484 = vst [vmem:[%s2085_s21 + $0x9f0] sm:$0xff] %v972_v10  ;;  %1485 = vst [vmem:[%s2085_s21 + $0x9f8] sm:$0xff] %v973_v11  ;;  %v490_v5 = vld [vmem:[%s2052_s6 + $0xaf0] sm:$0xff]  ;;  %v1002_v7 = vmul.f32 %v2064_v6, %v488_v3  ;;  %v1003_v8 = vmul.f32 %v2064_v6, %v489_v4  ;;  %v491_v10 = vld [vmem:[%s2052_s6 + $0xaf8] sm:$0xff] }
  0xe2   : > { %1486 = vst [vmem:[%s2085_s21 + $0xa00] sm:$0xff] %v974_v12  ;;  %1487 = vst [vmem:[%s2085_s21 + $0xa08] sm:$0xff] %v975_v16  ;;  %v1004_v9 = vmul.f32 %v2064_v6, %v490_v5  ;;  %v492_v11 = vld [vmem:[%s2052_s6 + $0xb00] sm:$0xff]  ;;  %v493_v12 = vld [vmem:[%s2052_s6 + $0xb08] sm:$0xff]  ;;  %v1005_v13 = vmul.f32 %v2064_v6, %v491_v10 }
  0xe3   : > { %1488 = vst [vmem:[%s2085_s21 + $0xa10] sm:$0xff] %v976_v17  ;;  %1489 = vst [vmem:[%s2085_s21 + $0xa18] sm:$0xff] %v977_v18  ;;  %v1006_v14 = vmul.f32 %v2064_v6, %v492_v11  ;;  %v1007_v15 = vmul.f32 %v2064_v6, %v493_v12  ;;  %v494_v16 = vld [vmem:[%s2052_s6 + $0xb10] sm:$0xff]  ;;  %v495_v17 = vld [vmem:[%s2052_s6 + $0xb18] sm:$0xff] }
  0xe4   : > { %1490 = vst [vmem:[%s2085_s21 + $0xa20] sm:$0xff] %v978_v22  ;;  %1491 = vst [vmem:[%s2085_s21 + $0xa28] sm:$0xff] %v979_v23  ;;  %v496_v18 = vld [vmem:[%s2052_s6 + $0xb20] sm:$0xff]  ;;  %v1008_v19 = vmul.f32 %v2064_v6, %v494_v16  ;;  %v1009_v20 = vmul.f32 %v2064_v6, %v495_v17  ;;  %v497_v22 = vld [vmem:[%s2052_s6 + $0xb28] sm:$0xff] }
  0xe5   : > { %1492 = vst [vmem:[%s2085_s21 + $0xa30] sm:$0xff] %v980_v24  ;;  %1493 = vst [vmem:[%s2085_s21 + $0xa38] sm:$0xff] %v981_v28  ;;  %v1010_v21 = vmul.f32 %v2064_v6, %v496_v18  ;;  %v498_v23 = vld [vmem:[%s2052_s6 + $0xb30] sm:$0xff]  ;;  %v499_v24 = vld [vmem:[%s2052_s6 + $0xb38] sm:$0xff]  ;;  %v1011_v25 = vmul.f32 %v2064_v6, %v497_v22 }
  0xe6   : > { %1494 = vst [vmem:[%s2085_s21 + $0xa40] sm:$0xff] %v982_v29  ;;  %1495 = vst [vmem:[%s2085_s21 + $0xa48] sm:$0xff] %v983_v30  ;;  %v1012_v26 = vmul.f32 %v2064_v6, %v498_v23  ;;  %v1013_v27 = vmul.f32 %v2064_v6, %v499_v24  ;;  %v500_v28 = vld [vmem:[%s2052_s6 + $0xb40] sm:$0xff]  ;;  %v501_v29 = vld [vmem:[%s2052_s6 + $0xb48] sm:$0xff] }
  0xe7   : > { %1496 = vst [vmem:[%s2085_s21 + $0xa50] sm:$0xff] %v984_v34  ;;  %1497 = vst [vmem:[%s2085_s21 + $0xa58] sm:$0xff] %v985_v35  ;;  %v502_v30 = vld [vmem:[%s2052_s6 + $0xb50] sm:$0xff]  ;;  %v1014_v31 = vmul.f32 %v2064_v6, %v500_v28  ;;  %v1015_v32 = vmul.f32 %v2064_v6, %v501_v29  ;;  %v503_v34 = vld [vmem:[%s2052_s6 + $0xb58] sm:$0xff] }
  0xe8   : > { %1498 = vst [vmem:[%s2085_s21 + $0xa60] sm:$0xff] %v986_v36  ;;  %1499 = vst [vmem:[%s2085_s21 + $0xa68] sm:$0xff] %v987_v40  ;;  %v1016_v33 = vmul.f32 %v2064_v6, %v502_v30  ;;  %v504_v35 = vld [vmem:[%s2052_s6 + $0xb60] sm:$0xff]  ;;  %v505_v36 = vld [vmem:[%s2052_s6 + $0xb68] sm:$0xff]  ;;  %v1017_v37 = vmul.f32 %v2064_v6, %v503_v34 }
  0xe9   : > { %1500 = vst [vmem:[%s2085_s21 + $0xa70] sm:$0xff] %v988_v41  ;;  %1501 = vst [vmem:[%s2085_s21 + $0xa78] sm:$0xff] %v989_v42  ;;  %v1018_v38 = vmul.f32 %v2064_v6, %v504_v35  ;;  %v1019_v39 = vmul.f32 %v2064_v6, %v505_v36  ;;  %v506_v40 = vld [vmem:[%s2052_s6 + $0xb70] sm:$0xff]  ;;  %v507_v41 = vld [vmem:[%s2052_s6 + $0xb78] sm:$0xff] }
  0xea   : > { %1502 = vst [vmem:[%s2085_s21 + $0xa80] sm:$0xff] %v990_v46  ;;  %1503 = vst [vmem:[%s2085_s21 + $0xa88] sm:$0xff] %v991_v47  ;;  %v508_v42 = vld [vmem:[%s2052_s6 + $0xb80] sm:$0xff]  ;;  %v1020_v43 = vmul.f32 %v2064_v6, %v506_v40  ;;  %v1021_v44 = vmul.f32 %v2064_v6, %v507_v41  ;;  %v509_v46 = vld [vmem:[%s2052_s6 + $0xb88] sm:$0xff] }
  0xeb   : > { %1504 = vst [vmem:[%s2085_s21 + $0xa90] sm:$0xff] %v992_v48  ;;  %1505 = vst [vmem:[%s2085_s21 + $0xa98] sm:$0xff] %v993_v52  ;;  %v1022_v45 = vmul.f32 %v2064_v6, %v508_v42  ;;  %v510_v47 = vld [vmem:[%s2052_s6 + $0xb90] sm:$0xff]  ;;  %v511_v48 = vld [vmem:[%s2052_s6 + $0xb98] sm:$0xff]  ;;  %v1023_v49 = vmul.f32 %v2064_v6, %v509_v46 }
  0xec   : > { %1506 = vst [vmem:[%s2085_s21 + $0xaa0] sm:$0xff] %v994_v53  ;;  %1507 = vst [vmem:[%s2085_s21 + $0xaa8] sm:$0xff] %v995_v54  ;;  %v1024_v50 = vmul.f32 %v2064_v6, %v510_v47  ;;  %v1025_v51 = vmul.f32 %v2064_v6, %v511_v48  ;;  %v512_v52 = vld [vmem:[%s2052_s6 + $0xba0] sm:$0xff]  ;;  %v513_v53 = vld [vmem:[%s2052_s6 + $0xba8] sm:$0xff] }
  0xed   : > { %1508 = vst [vmem:[%s2085_s21 + $0xab0] sm:$0xff] %v996_v58  ;;  %1509 = vst [vmem:[%s2085_s21 + $0xab8] sm:$0xff] %v997_v59  ;;  %v514_v54 = vld [vmem:[%s2052_s6 + $0xbb0] sm:$0xff]  ;;  %v1026_v55 = vmul.f32 %v2064_v6, %v512_v52  ;;  %v1027_v56 = vmul.f32 %v2064_v6, %v513_v53  ;;  %v515_v58 = vld [vmem:[%s2052_s6 + $0xbb8] sm:$0xff] }
  0xee   : > { %1510 = vst [vmem:[%s2085_s21 + $0xac0] sm:$0xff] %v998_v60  ;;  %1511 = vst [vmem:[%s2085_s21 + $0xac8] sm:$0xff] %v999_v0  ;;  %v1028_v57 = vmul.f32 %v2064_v6, %v514_v54  ;;  %v516_v59 = vld [vmem:[%s2052_s6 + $0xbc0] sm:$0xff]  ;;  %v517_v60 = vld [vmem:[%s2052_s6 + $0xbc8] sm:$0xff]  ;;  %v1029_v61 = vmul.f32 %v2064_v6, %v515_v58 }
  0xef   : > { %1512 = vst [vmem:[%s2085_s21 + $0xad0] sm:$0xff] %v1000_v1  ;;  %1513 = vst [vmem:[%s2085_s21 + $0xad8] sm:$0xff] %v1001_v2  ;;  %v1030_v62 = vmul.f32 %v2064_v6, %v516_v59  ;;  %v1031_v63 = vmul.f32 %v2064_v6, %v517_v60  ;;  %v518_v0 = vld [vmem:[%s2052_s6 + $0xbd0] sm:$0xff]  ;;  %v519_v1 = vld [vmem:[%s2052_s6 + $0xbd8] sm:$0xff] }
  0xf0   : > { %1514 = vst [vmem:[%s2085_s21 + $0xae0] sm:$0xff] %v1002_v7  ;;  %1515 = vst [vmem:[%s2085_s21 + $0xae8] sm:$0xff] %v1003_v8  ;;  %v520_v2 = vld [vmem:[%s2052_s6 + $0xbe0] sm:$0xff]  ;;  %v1032_v3 = vmul.f32 %v2064_v6, %v518_v0  ;;  %v1033_v4 = vmul.f32 %v2064_v6, %v519_v1  ;;  %v521_v7 = vld [vmem:[%s2052_s6 + $0xbe8] sm:$0xff] }
  0xf1   : > { %1516 = vst [vmem:[%s2085_s21 + $0xaf0] sm:$0xff] %v1004_v9  ;;  %1517 = vst [vmem:[%s2085_s21 + $0xaf8] sm:$0xff] %v1005_v13  ;;  %v1034_v5 = vmul.f32 %v2064_v6, %v520_v2  ;;  %v522_v8 = vld [vmem:[%s2052_s6 + $0xbf0] sm:$0xff]  ;;  %v523_v9 = vld [vmem:[%s2052_s6 + $0xbf8] sm:$0xff]  ;;  %v1035_v10 = vmul.f32 %v2064_v6, %v521_v7 }
  0xf2   : > { %1518 = vst [vmem:[%s2085_s21 + $0xb00] sm:$0xff] %v1006_v14  ;;  %1519 = vst [vmem:[%s2085_s21 + $0xb08] sm:$0xff] %v1007_v15  ;;  %v1036_v11 = vmul.f32 %v2064_v6, %v522_v8  ;;  %v1037_v12 = vmul.f32 %v2064_v6, %v523_v9  ;;  %v524_v13 = vld [vmem:[%s2052_s6 + $0xc00] sm:$0xff]  ;;  %v525_v14 = vld [vmem:[%s2052_s6 + $0xc08] sm:$0xff] }
  0xf3   : > { %1520 = vst [vmem:[%s2085_s21 + $0xb10] sm:$0xff] %v1008_v19  ;;  %1521 = vst [vmem:[%s2085_s21 + $0xb18] sm:$0xff] %v1009_v20  ;;  %v526_v15 = vld [vmem:[%s2052_s6 + $0xc10] sm:$0xff]  ;;  %v1038_v16 = vmul.f32 %v2064_v6, %v524_v13  ;;  %v1039_v17 = vmul.f32 %v2064_v6, %v525_v14  ;;  %v527_v19 = vld [vmem:[%s2052_s6 + $0xc18] sm:$0xff] }
  0xf4   : > { %1522 = vst [vmem:[%s2085_s21 + $0xb20] sm:$0xff] %v1010_v21  ;;  %1523 = vst [vmem:[%s2085_s21 + $0xb28] sm:$0xff] %v1011_v25  ;;  %v1040_v18 = vmul.f32 %v2064_v6, %v526_v15  ;;  %v528_v20 = vld [vmem:[%s2052_s6 + $0xc20] sm:$0xff]  ;;  %v529_v21 = vld [vmem:[%s2052_s6 + $0xc28] sm:$0xff]  ;;  %v1041_v22 = vmul.f32 %v2064_v6, %v527_v19 }
  0xf5   : > { %1524 = vst [vmem:[%s2085_s21 + $0xb30] sm:$0xff] %v1012_v26  ;;  %1525 = vst [vmem:[%s2085_s21 + $0xb38] sm:$0xff] %v1013_v27  ;;  %v1042_v23 = vmul.f32 %v2064_v6, %v528_v20  ;;  %v1043_v24 = vmul.f32 %v2064_v6, %v529_v21  ;;  %v530_v25 = vld [vmem:[%s2052_s6 + $0xc30] sm:$0xff]  ;;  %v531_v26 = vld [vmem:[%s2052_s6 + $0xc38] sm:$0xff] }
  0xf6   : > { %1526 = vst [vmem:[%s2085_s21 + $0xb40] sm:$0xff] %v1014_v31  ;;  %1527 = vst [vmem:[%s2085_s21 + $0xb48] sm:$0xff] %v1015_v32  ;;  %v532_v27 = vld [vmem:[%s2052_s6 + $0xc40] sm:$0xff]  ;;  %v1044_v28 = vmul.f32 %v2064_v6, %v530_v25  ;;  %v1045_v29 = vmul.f32 %v2064_v6, %v531_v26  ;;  %v533_v31 = vld [vmem:[%s2052_s6 + $0xc48] sm:$0xff] }
  0xf7   : > { %1528 = vst [vmem:[%s2085_s21 + $0xb50] sm:$0xff] %v1016_v33  ;;  %1529 = vst [vmem:[%s2085_s21 + $0xb58] sm:$0xff] %v1017_v37  ;;  %v1046_v30 = vmul.f32 %v2064_v6, %v532_v27  ;;  %v534_v32 = vld [vmem:[%s2052_s6 + $0xc50] sm:$0xff]  ;;  %v535_v33 = vld [vmem:[%s2052_s6 + $0xc58] sm:$0xff]  ;;  %v1047_v34 = vmul.f32 %v2064_v6, %v533_v31 }
  0xf8   : > { %1530 = vst [vmem:[%s2085_s21 + $0xb60] sm:$0xff] %v1018_v38  ;;  %1531 = vst [vmem:[%s2085_s21 + $0xb68] sm:$0xff] %v1019_v39  ;;  %v1048_v35 = vmul.f32 %v2064_v6, %v534_v32  ;;  %v1049_v36 = vmul.f32 %v2064_v6, %v535_v33  ;;  %v536_v37 = vld [vmem:[%s2052_s6 + $0xc60] sm:$0xff]  ;;  %v537_v38 = vld [vmem:[%s2052_s6 + $0xc68] sm:$0xff] }
  0xf9   : > { %1532 = vst [vmem:[%s2085_s21 + $0xb70] sm:$0xff] %v1020_v43  ;;  %1533 = vst [vmem:[%s2085_s21 + $0xb78] sm:$0xff] %v1021_v44  ;;  %v538_v39 = vld [vmem:[%s2052_s6 + $0xc70] sm:$0xff]  ;;  %v1050_v40 = vmul.f32 %v2064_v6, %v536_v37  ;;  %v1051_v41 = vmul.f32 %v2064_v6, %v537_v38  ;;  %v539_v43 = vld [vmem:[%s2052_s6 + $0xc78] sm:$0xff] }
  0xfa   : > { %1534 = vst [vmem:[%s2085_s21 + $0xb80] sm:$0xff] %v1022_v45  ;;  %1535 = vst [vmem:[%s2085_s21 + $0xb88] sm:$0xff] %v1023_v49  ;;  %v1052_v42 = vmul.f32 %v2064_v6, %v538_v39  ;;  %v540_v44 = vld [vmem:[%s2052_s6 + $0xc80] sm:$0xff]  ;;  %v541_v45 = vld [vmem:[%s2052_s6 + $0xc88] sm:$0xff]  ;;  %v1053_v46 = vmul.f32 %v2064_v6, %v539_v43 }
  0xfb   : > { %1536 = vst [vmem:[%s2085_s21 + $0xb90] sm:$0xff] %v1024_v50  ;;  %1537 = vst [vmem:[%s2085_s21 + $0xb98] sm:$0xff] %v1025_v51  ;;  %v1054_v47 = vmul.f32 %v2064_v6, %v540_v44  ;;  %v1055_v48 = vmul.f32 %v2064_v6, %v541_v45  ;;  %v542_v49 = vld [vmem:[%s2052_s6 + $0xc90] sm:$0xff]  ;;  %v543_v50 = vld [vmem:[%s2052_s6 + $0xc98] sm:$0xff] }
  0xfc   : > { %1538 = vst [vmem:[%s2085_s21 + $0xba0] sm:$0xff] %v1026_v55  ;;  %1539 = vst [vmem:[%s2085_s21 + $0xba8] sm:$0xff] %v1027_v56  ;;  %v544_v51 = vld [vmem:[%s2052_s6 + $0xca0] sm:$0xff]  ;;  %v1056_v52 = vmul.f32 %v2064_v6, %v542_v49  ;;  %v1057_v53 = vmul.f32 %v2064_v6, %v543_v50  ;;  %v545_v55 = vld [vmem:[%s2052_s6 + $0xca8] sm:$0xff] }
  0xfd   : > { %1540 = vst [vmem:[%s2085_s21 + $0xbb0] sm:$0xff] %v1028_v57  ;;  %1541 = vst [vmem:[%s2085_s21 + $0xbb8] sm:$0xff] %v1029_v61  ;;  %v1058_v54 = vmul.f32 %v2064_v6, %v544_v51  ;;  %v546_v56 = vld [vmem:[%s2052_s6 + $0xcb0] sm:$0xff]  ;;  %v547_v57 = vld [vmem:[%s2052_s6 + $0xcb8] sm:$0xff]  ;;  %v1059_v58 = vmul.f32 %v2064_v6, %v545_v55 }
  0xfe   : > { %1542 = vst [vmem:[%s2085_s21 + $0xbc0] sm:$0xff] %v1030_v62  ;;  %1543 = vst [vmem:[%s2085_s21 + $0xbc8] sm:$0xff] %v1031_v63  ;;  %v1060_v59 = vmul.f32 %v2064_v6, %v546_v56  ;;  %v1061_v60 = vmul.f32 %v2064_v6, %v547_v57  ;;  %v548_v61 = vld [vmem:[%s2052_s6 + $0xcc0] sm:$0xff]  ;;  %v549_v62 = vld [vmem:[%s2052_s6 + $0xcc8] sm:$0xff] }
  0xff   : > { %1544 = vst [vmem:[%s2085_s21 + $0xbd0] sm:$0xff] %v1032_v3  ;;  %1545 = vst [vmem:[%s2085_s21 + $0xbd8] sm:$0xff] %v1033_v4  ;;  %v550_v63 = vld [vmem:[%s2052_s6 + $0xcd0] sm:$0xff]  ;;  %v1062_v0 = vmul.f32 %v2064_v6, %v548_v61  ;;  %v1063_v1 = vmul.f32 %v2064_v6, %v549_v62  ;;  %v551_v3 = vld [vmem:[%s2052_s6 + $0xcd8] sm:$0xff] }
 0x100   : > { %1546 = vst [vmem:[%s2085_s21 + $0xbe0] sm:$0xff] %v1034_v5  ;;  %1547 = vst [vmem:[%s2085_s21 + $0xbe8] sm:$0xff] %v1035_v10  ;;  %v1064_v2 = vmul.f32 %v2064_v6, %v550_v63  ;;  %v552_v4 = vld [vmem:[%s2052_s6 + $0xce0] sm:$0xff]  ;;  %v553_v5 = vld [vmem:[%s2052_s6 + $0xce8] sm:$0xff]  ;;  %v1065_v7 = vmul.f32 %v2064_v6, %v551_v3 }
 0x101   : > { %1548 = vst [vmem:[%s2085_s21 + $0xbf0] sm:$0xff] %v1036_v11  ;;  %1549 = vst [vmem:[%s2085_s21 + $0xbf8] sm:$0xff] %v1037_v12  ;;  %v1066_v8 = vmul.f32 %v2064_v6, %v552_v4  ;;  %v1067_v9 = vmul.f32 %v2064_v6, %v553_v5  ;;  %v554_v10 = vld [vmem:[%s2052_s6 + $0xcf0] sm:$0xff]  ;;  %v555_v11 = vld [vmem:[%s2052_s6 + $0xcf8] sm:$0xff] }
 0x102   : > { %1550 = vst [vmem:[%s2085_s21 + $0xc00] sm:$0xff] %v1038_v16  ;;  %1551 = vst [vmem:[%s2085_s21 + $0xc08] sm:$0xff] %v1039_v17  ;;  %v556_v12 = vld [vmem:[%s2052_s6 + $0xd00] sm:$0xff]  ;;  %v1068_v13 = vmul.f32 %v2064_v6, %v554_v10  ;;  %v1069_v14 = vmul.f32 %v2064_v6, %v555_v11  ;;  %v557_v16 = vld [vmem:[%s2052_s6 + $0xd08] sm:$0xff] }
 0x103   : > { %1552 = vst [vmem:[%s2085_s21 + $0xc10] sm:$0xff] %v1040_v18  ;;  %1553 = vst [vmem:[%s2085_s21 + $0xc18] sm:$0xff] %v1041_v22  ;;  %v1070_v15 = vmul.f32 %v2064_v6, %v556_v12  ;;  %v558_v17 = vld [vmem:[%s2052_s6 + $0xd10] sm:$0xff]  ;;  %v559_v18 = vld [vmem:[%s2052_s6 + $0xd18] sm:$0xff]  ;;  %v1071_v19 = vmul.f32 %v2064_v6, %v557_v16 }
 0x104   : > { %1554 = vst [vmem:[%s2085_s21 + $0xc20] sm:$0xff] %v1042_v23  ;;  %1555 = vst [vmem:[%s2085_s21 + $0xc28] sm:$0xff] %v1043_v24  ;;  %v1072_v20 = vmul.f32 %v2064_v6, %v558_v17  ;;  %v1073_v21 = vmul.f32 %v2064_v6, %v559_v18  ;;  %v560_v22 = vld [vmem:[%s2052_s6 + $0xd20] sm:$0xff]  ;;  %v561_v23 = vld [vmem:[%s2052_s6 + $0xd28] sm:$0xff] }
 0x105   : > { %1556 = vst [vmem:[%s2085_s21 + $0xc30] sm:$0xff] %v1044_v28  ;;  %1557 = vst [vmem:[%s2085_s21 + $0xc38] sm:$0xff] %v1045_v29  ;;  %v562_v24 = vld [vmem:[%s2052_s6 + $0xd30] sm:$0xff]  ;;  %v1074_v25 = vmul.f32 %v2064_v6, %v560_v22  ;;  %v1075_v26 = vmul.f32 %v2064_v6, %v561_v23  ;;  %v563_v28 = vld [vmem:[%s2052_s6 + $0xd38] sm:$0xff] }
 0x106   : > { %1558 = vst [vmem:[%s2085_s21 + $0xc40] sm:$0xff] %v1046_v30  ;;  %1559 = vst [vmem:[%s2085_s21 + $0xc48] sm:$0xff] %v1047_v34  ;;  %v1076_v27 = vmul.f32 %v2064_v6, %v562_v24  ;;  %v564_v29 = vld [vmem:[%s2052_s6 + $0xd40] sm:$0xff]  ;;  %v565_v30 = vld [vmem:[%s2052_s6 + $0xd48] sm:$0xff]  ;;  %v1077_v31 = vmul.f32 %v2064_v6, %v563_v28 }
 0x107   : > { %1560 = vst [vmem:[%s2085_s21 + $0xc50] sm:$0xff] %v1048_v35  ;;  %1561 = vst [vmem:[%s2085_s21 + $0xc58] sm:$0xff] %v1049_v36  ;;  %v1078_v32 = vmul.f32 %v2064_v6, %v564_v29  ;;  %v1079_v33 = vmul.f32 %v2064_v6, %v565_v30  ;;  %v566_v34 = vld [vmem:[%s2052_s6 + $0xd50] sm:$0xff]  ;;  %v567_v35 = vld [vmem:[%s2052_s6 + $0xd58] sm:$0xff] }
 0x108   : > { %1562 = vst [vmem:[%s2085_s21 + $0xc60] sm:$0xff] %v1050_v40  ;;  %1563 = vst [vmem:[%s2085_s21 + $0xc68] sm:$0xff] %v1051_v41  ;;  %v568_v36 = vld [vmem:[%s2052_s6 + $0xd60] sm:$0xff]  ;;  %v1080_v37 = vmul.f32 %v2064_v6, %v566_v34  ;;  %v1081_v38 = vmul.f32 %v2064_v6, %v567_v35  ;;  %v569_v40 = vld [vmem:[%s2052_s6 + $0xd68] sm:$0xff] }
 0x109   : > { %1564 = vst [vmem:[%s2085_s21 + $0xc70] sm:$0xff] %v1052_v42  ;;  %1565 = vst [vmem:[%s2085_s21 + $0xc78] sm:$0xff] %v1053_v46  ;;  %v1082_v39 = vmul.f32 %v2064_v6, %v568_v36  ;;  %v570_v41 = vld [vmem:[%s2052_s6 + $0xd70] sm:$0xff]  ;;  %v571_v42 = vld [vmem:[%s2052_s6 + $0xd78] sm:$0xff]  ;;  %v1083_v43 = vmul.f32 %v2064_v6, %v569_v40 }
 0x10a   : > { %1566 = vst [vmem:[%s2085_s21 + $0xc80] sm:$0xff] %v1054_v47  ;;  %1567 = vst [vmem:[%s2085_s21 + $0xc88] sm:$0xff] %v1055_v48  ;;  %v1084_v44 = vmul.f32 %v2064_v6, %v570_v41  ;;  %v1085_v45 = vmul.f32 %v2064_v6, %v571_v42  ;;  %v572_v46 = vld [vmem:[%s2052_s6 + $0xd80] sm:$0xff]  ;;  %v573_v47 = vld [vmem:[%s2052_s6 + $0xd88] sm:$0xff] }
 0x10b   : > { %1568 = vst [vmem:[%s2085_s21 + $0xc90] sm:$0xff] %v1056_v52  ;;  %1569 = vst [vmem:[%s2085_s21 + $0xc98] sm:$0xff] %v1057_v53  ;;  %v574_v48 = vld [vmem:[%s2052_s6 + $0xd90] sm:$0xff]  ;;  %v1086_v49 = vmul.f32 %v2064_v6, %v572_v46  ;;  %v1087_v50 = vmul.f32 %v2064_v6, %v573_v47  ;;  %v575_v52 = vld [vmem:[%s2052_s6 + $0xd98] sm:$0xff] }
 0x10c   : > { %1570 = vst [vmem:[%s2085_s21 + $0xca0] sm:$0xff] %v1058_v54  ;;  %1571 = vst [vmem:[%s2085_s21 + $0xca8] sm:$0xff] %v1059_v58  ;;  %v1088_v51 = vmul.f32 %v2064_v6, %v574_v48  ;;  %v576_v53 = vld [vmem:[%s2052_s6 + $0xda0] sm:$0xff]  ;;  %v577_v54 = vld [vmem:[%s2052_s6 + $0xda8] sm:$0xff]  ;;  %v1089_v55 = vmul.f32 %v2064_v6, %v575_v52 }
 0x10d   : > { %1572 = vst [vmem:[%s2085_s21 + $0xcb0] sm:$0xff] %v1060_v59  ;;  %1573 = vst [vmem:[%s2085_s21 + $0xcb8] sm:$0xff] %v1061_v60  ;;  %v1090_v56 = vmul.f32 %v2064_v6, %v576_v53  ;;  %v1091_v57 = vmul.f32 %v2064_v6, %v577_v54  ;;  %v578_v58 = vld [vmem:[%s2052_s6 + $0xdb0] sm:$0xff]  ;;  %v579_v59 = vld [vmem:[%s2052_s6 + $0xdb8] sm:$0xff] }
 0x10e   : > { %1574 = vst [vmem:[%s2085_s21 + $0xcc0] sm:$0xff] %v1062_v0  ;;  %1575 = vst [vmem:[%s2085_s21 + $0xcc8] sm:$0xff] %v1063_v1  ;;  %v580_v60 = vld [vmem:[%s2052_s6 + $0xdc0] sm:$0xff]  ;;  %v1092_v61 = vmul.f32 %v2064_v6, %v578_v58  ;;  %v1093_v62 = vmul.f32 %v2064_v6, %v579_v59  ;;  %v581_v0 = vld [vmem:[%s2052_s6 + $0xdc8] sm:$0xff] }
 0x10f   : > { %1576 = vst [vmem:[%s2085_s21 + $0xcd0] sm:$0xff] %v1064_v2  ;;  %1577 = vst [vmem:[%s2085_s21 + $0xcd8] sm:$0xff] %v1065_v7  ;;  %v1094_v63 = vmul.f32 %v2064_v6, %v580_v60  ;;  %v582_v1 = vld [vmem:[%s2052_s6 + $0xdd0] sm:$0xff]  ;;  %v583_v2 = vld [vmem:[%s2052_s6 + $0xdd8] sm:$0xff]  ;;  %v1095_v3 = vmul.f32 %v2064_v6, %v581_v0 }
 0x110   : > { %1578 = vst [vmem:[%s2085_s21 + $0xce0] sm:$0xff] %v1066_v8  ;;  %1579 = vst [vmem:[%s2085_s21 + $0xce8] sm:$0xff] %v1067_v9  ;;  %v1096_v4 = vmul.f32 %v2064_v6, %v582_v1  ;;  %v1097_v5 = vmul.f32 %v2064_v6, %v583_v2  ;;  %v584_v7 = vld [vmem:[%s2052_s6 + $0xde0] sm:$0xff]  ;;  %v585_v8 = vld [vmem:[%s2052_s6 + $0xde8] sm:$0xff] }
 0x111   : > { %1580 = vst [vmem:[%s2085_s21 + $0xcf0] sm:$0xff] %v1068_v13  ;;  %1581 = vst [vmem:[%s2085_s21 + $0xcf8] sm:$0xff] %v1069_v14  ;;  %v586_v9 = vld [vmem:[%s2052_s6 + $0xdf0] sm:$0xff]  ;;  %v1098_v10 = vmul.f32 %v2064_v6, %v584_v7  ;;  %v1099_v11 = vmul.f32 %v2064_v6, %v585_v8  ;;  %v587_v13 = vld [vmem:[%s2052_s6 + $0xdf8] sm:$0xff] }
 0x112   : > { %1582 = vst [vmem:[%s2085_s21 + $0xd00] sm:$0xff] %v1070_v15  ;;  %1583 = vst [vmem:[%s2085_s21 + $0xd08] sm:$0xff] %v1071_v19  ;;  %v1100_v12 = vmul.f32 %v2064_v6, %v586_v9  ;;  %v588_v14 = vld [vmem:[%s2052_s6 + $0xe00] sm:$0xff]  ;;  %v589_v15 = vld [vmem:[%s2052_s6 + $0xe08] sm:$0xff]  ;;  %v1101_v16 = vmul.f32 %v2064_v6, %v587_v13 }
 0x113   : > { %1584 = vst [vmem:[%s2085_s21 + $0xd10] sm:$0xff] %v1072_v20  ;;  %1585 = vst [vmem:[%s2085_s21 + $0xd18] sm:$0xff] %v1073_v21  ;;  %v1102_v17 = vmul.f32 %v2064_v6, %v588_v14  ;;  %v1103_v18 = vmul.f32 %v2064_v6, %v589_v15  ;;  %v590_v19 = vld [vmem:[%s2052_s6 + $0xe10] sm:$0xff]  ;;  %v591_v20 = vld [vmem:[%s2052_s6 + $0xe18] sm:$0xff] }
 0x114   : > { %1586 = vst [vmem:[%s2085_s21 + $0xd20] sm:$0xff] %v1074_v25  ;;  %1587 = vst [vmem:[%s2085_s21 + $0xd28] sm:$0xff] %v1075_v26  ;;  %v592_v21 = vld [vmem:[%s2052_s6 + $0xe20] sm:$0xff]  ;;  %v1104_v22 = vmul.f32 %v2064_v6, %v590_v19  ;;  %v1105_v23 = vmul.f32 %v2064_v6, %v591_v20  ;;  %v593_v25 = vld [vmem:[%s2052_s6 + $0xe28] sm:$0xff] }
 0x115   : > { %1588 = vst [vmem:[%s2085_s21 + $0xd30] sm:$0xff] %v1076_v27  ;;  %1589 = vst [vmem:[%s2085_s21 + $0xd38] sm:$0xff] %v1077_v31  ;;  %v1106_v24 = vmul.f32 %v2064_v6, %v592_v21  ;;  %v594_v26 = vld [vmem:[%s2052_s6 + $0xe30] sm:$0xff]  ;;  %v595_v27 = vld [vmem:[%s2052_s6 + $0xe38] sm:$0xff]  ;;  %v1107_v28 = vmul.f32 %v2064_v6, %v593_v25 }
 0x116   : > { %1590 = vst [vmem:[%s2085_s21 + $0xd40] sm:$0xff] %v1078_v32  ;;  %1591 = vst [vmem:[%s2085_s21 + $0xd48] sm:$0xff] %v1079_v33  ;;  %v1108_v29 = vmul.f32 %v2064_v6, %v594_v26  ;;  %v1109_v30 = vmul.f32 %v2064_v6, %v595_v27  ;;  %v596_v31 = vld [vmem:[%s2052_s6 + $0xe40] sm:$0xff]  ;;  %v597_v32 = vld [vmem:[%s2052_s6 + $0xe48] sm:$0xff] }
 0x117   : > { %1592 = vst [vmem:[%s2085_s21 + $0xd50] sm:$0xff] %v1080_v37  ;;  %1593 = vst [vmem:[%s2085_s21 + $0xd58] sm:$0xff] %v1081_v38  ;;  %v598_v33 = vld [vmem:[%s2052_s6 + $0xe50] sm:$0xff]  ;;  %v1110_v34 = vmul.f32 %v2064_v6, %v596_v31  ;;  %v1111_v35 = vmul.f32 %v2064_v6, %v597_v32  ;;  %v599_v37 = vld [vmem:[%s2052_s6 + $0xe58] sm:$0xff] }
 0x118   : > { %1594 = vst [vmem:[%s2085_s21 + $0xd60] sm:$0xff] %v1082_v39  ;;  %1595 = vst [vmem:[%s2085_s21 + $0xd68] sm:$0xff] %v1083_v43  ;;  %v1112_v36 = vmul.f32 %v2064_v6, %v598_v33  ;;  %v600_v38 = vld [vmem:[%s2052_s6 + $0xe60] sm:$0xff]  ;;  %v601_v39 = vld [vmem:[%s2052_s6 + $0xe68] sm:$0xff]  ;;  %v1113_v40 = vmul.f32 %v2064_v6, %v599_v37 }
 0x119   : > { %1596 = vst [vmem:[%s2085_s21 + $0xd70] sm:$0xff] %v1084_v44  ;;  %1597 = vst [vmem:[%s2085_s21 + $0xd78] sm:$0xff] %v1085_v45  ;;  %v1114_v41 = vmul.f32 %v2064_v6, %v600_v38  ;;  %v1115_v42 = vmul.f32 %v2064_v6, %v601_v39  ;;  %v602_v43 = vld [vmem:[%s2052_s6 + $0xe70] sm:$0xff]  ;;  %v603_v44 = vld [vmem:[%s2052_s6 + $0xe78] sm:$0xff] }
 0x11a   : > { %1598 = vst [vmem:[%s2085_s21 + $0xd80] sm:$0xff] %v1086_v49  ;;  %1599 = vst [vmem:[%s2085_s21 + $0xd88] sm:$0xff] %v1087_v50  ;;  %v604_v45 = vld [vmem:[%s2052_s6 + $0xe80] sm:$0xff]  ;;  %v1116_v46 = vmul.f32 %v2064_v6, %v602_v43  ;;  %v1117_v47 = vmul.f32 %v2064_v6, %v603_v44  ;;  %v605_v49 = vld [vmem:[%s2052_s6 + $0xe88] sm:$0xff] }
 0x11b   : > { %1600 = vst [vmem:[%s2085_s21 + $0xd90] sm:$0xff] %v1088_v51  ;;  %1601 = vst [vmem:[%s2085_s21 + $0xd98] sm:$0xff] %v1089_v55  ;;  %v1118_v48 = vmul.f32 %v2064_v6, %v604_v45  ;;  %v606_v50 = vld [vmem:[%s2052_s6 + $0xe90] sm:$0xff]  ;;  %v607_v51 = vld [vmem:[%s2052_s6 + $0xe98] sm:$0xff]  ;;  %v1119_v52 = vmul.f32 %v2064_v6, %v605_v49 }
 0x11c   : > { %1602 = vst [vmem:[%s2085_s21 + $0xda0] sm:$0xff] %v1090_v56  ;;  %1603 = vst [vmem:[%s2085_s21 + $0xda8] sm:$0xff] %v1091_v57  ;;  %v1120_v53 = vmul.f32 %v2064_v6, %v606_v50  ;;  %v1121_v54 = vmul.f32 %v2064_v6, %v607_v51  ;;  %v608_v55 = vld [vmem:[%s2052_s6 + $0xea0] sm:$0xff]  ;;  %v609_v56 = vld [vmem:[%s2052_s6 + $0xea8] sm:$0xff] }
 0x11d   : > { %1604 = vst [vmem:[%s2085_s21 + $0xdb0] sm:$0xff] %v1092_v61  ;;  %1605 = vst [vmem:[%s2085_s21 + $0xdb8] sm:$0xff] %v1093_v62  ;;  %v610_v57 = vld [vmem:[%s2052_s6 + $0xeb0] sm:$0xff]  ;;  %v1122_v58 = vmul.f32 %v2064_v6, %v608_v55  ;;  %v1123_v59 = vmul.f32 %v2064_v6, %v609_v56  ;;  %v611_v61 = vld [vmem:[%s2052_s6 + $0xeb8] sm:$0xff] }
 0x11e   : > { %1606 = vst [vmem:[%s2085_s21 + $0xdc0] sm:$0xff] %v1094_v63  ;;  %1607 = vst [vmem:[%s2085_s21 + $0xdc8] sm:$0xff] %v1095_v3  ;;  %v1124_v60 = vmul.f32 %v2064_v6, %v610_v57  ;;  %v612_v62 = vld [vmem:[%s2052_s6 + $0xec0] sm:$0xff]  ;;  %v613_v63 = vld [vmem:[%s2052_s6 + $0xec8] sm:$0xff]  ;;  %v1125_v0 = vmul.f32 %v2064_v6, %v611_v61 }
 0x11f   : > { %1608 = vst [vmem:[%s2085_s21 + $0xdd0] sm:$0xff] %v1096_v4  ;;  %1609 = vst [vmem:[%s2085_s21 + $0xdd8] sm:$0xff] %v1097_v5  ;;  %v1126_v1 = vmul.f32 %v2064_v6, %v612_v62  ;;  %v1127_v2 = vmul.f32 %v2064_v6, %v613_v63  ;;  %v614_v3 = vld [vmem:[%s2052_s6 + $0xed0] sm:$0xff]  ;;  %v615_v4 = vld [vmem:[%s2052_s6 + $0xed8] sm:$0xff] }
 0x120   : > { %1610 = vst [vmem:[%s2085_s21 + $0xde0] sm:$0xff] %v1098_v10  ;;  %1611 = vst [vmem:[%s2085_s21 + $0xde8] sm:$0xff] %v1099_v11  ;;  %v616_v5 = vld [vmem:[%s2052_s6 + $0xee0] sm:$0xff]  ;;  %v1128_v7 = vmul.f32 %v2064_v6, %v614_v3  ;;  %v1129_v8 = vmul.f32 %v2064_v6, %v615_v4  ;;  %v617_v10 = vld [vmem:[%s2052_s6 + $0xee8] sm:$0xff] }
 0x121   : > { %1612 = vst [vmem:[%s2085_s21 + $0xdf0] sm:$0xff] %v1100_v12  ;;  %1613 = vst [vmem:[%s2085_s21 + $0xdf8] sm:$0xff] %v1101_v16  ;;  %v1130_v9 = vmul.f32 %v2064_v6, %v616_v5  ;;  %v618_v11 = vld [vmem:[%s2052_s6 + $0xef0] sm:$0xff]  ;;  %v619_v12 = vld [vmem:[%s2052_s6 + $0xef8] sm:$0xff]  ;;  %v1131_v13 = vmul.f32 %v2064_v6, %v617_v10 }
 0x122   : > { %1614 = vst [vmem:[%s2085_s21 + $0xe00] sm:$0xff] %v1102_v17  ;;  %1615 = vst [vmem:[%s2085_s21 + $0xe08] sm:$0xff] %v1103_v18  ;;  %v1132_v14 = vmul.f32 %v2064_v6, %v618_v11  ;;  %v1133_v15 = vmul.f32 %v2064_v6, %v619_v12  ;;  %v620_v16 = vld [vmem:[%s2052_s6 + $0xf00] sm:$0xff]  ;;  %v621_v17 = vld [vmem:[%s2052_s6 + $0xf08] sm:$0xff] }
 0x123   : > { %1616 = vst [vmem:[%s2085_s21 + $0xe10] sm:$0xff] %v1104_v22  ;;  %1617 = vst [vmem:[%s2085_s21 + $0xe18] sm:$0xff] %v1105_v23  ;;  %v622_v18 = vld [vmem:[%s2052_s6 + $0xf10] sm:$0xff]  ;;  %v1134_v19 = vmul.f32 %v2064_v6, %v620_v16  ;;  %v1135_v20 = vmul.f32 %v2064_v6, %v621_v17  ;;  %v623_v22 = vld [vmem:[%s2052_s6 + $0xf18] sm:$0xff] }
 0x124   : > { %1618 = vst [vmem:[%s2085_s21 + $0xe20] sm:$0xff] %v1106_v24  ;;  %1619 = vst [vmem:[%s2085_s21 + $0xe28] sm:$0xff] %v1107_v28  ;;  %v1136_v21 = vmul.f32 %v2064_v6, %v622_v18  ;;  %v624_v23 = vld [vmem:[%s2052_s6 + $0xf20] sm:$0xff]  ;;  %v625_v24 = vld [vmem:[%s2052_s6 + $0xf28] sm:$0xff]  ;;  %v1137_v25 = vmul.f32 %v2064_v6, %v623_v22 }
 0x125   : > { %1620 = vst [vmem:[%s2085_s21 + $0xe30] sm:$0xff] %v1108_v29  ;;  %1621 = vst [vmem:[%s2085_s21 + $0xe38] sm:$0xff] %v1109_v30  ;;  %v1138_v26 = vmul.f32 %v2064_v6, %v624_v23  ;;  %v1139_v27 = vmul.f32 %v2064_v6, %v625_v24  ;;  %v626_v28 = vld [vmem:[%s2052_s6 + $0xf30] sm:$0xff]  ;;  %v627_v29 = vld [vmem:[%s2052_s6 + $0xf38] sm:$0xff] }
 0x126   : > { %1622 = vst [vmem:[%s2085_s21 + $0xe40] sm:$0xff] %v1110_v34  ;;  %1623 = vst [vmem:[%s2085_s21 + $0xe48] sm:$0xff] %v1111_v35  ;;  %v628_v30 = vld [vmem:[%s2052_s6 + $0xf40] sm:$0xff]  ;;  %v1140_v31 = vmul.f32 %v2064_v6, %v626_v28  ;;  %v1141_v32 = vmul.f32 %v2064_v6, %v627_v29  ;;  %v629_v34 = vld [vmem:[%s2052_s6 + $0xf48] sm:$0xff] }
 0x127   : > { %1624 = vst [vmem:[%s2085_s21 + $0xe50] sm:$0xff] %v1112_v36  ;;  %1625 = vst [vmem:[%s2085_s21 + $0xe58] sm:$0xff] %v1113_v40  ;;  %v1142_v33 = vmul.f32 %v2064_v6, %v628_v30  ;;  %v630_v35 = vld [vmem:[%s2052_s6 + $0xf50] sm:$0xff]  ;;  %v631_v36 = vld [vmem:[%s2052_s6 + $0xf58] sm:$0xff]  ;;  %v1143_v37 = vmul.f32 %v2064_v6, %v629_v34 }
 0x128   : > { %1626 = vst [vmem:[%s2085_s21 + $0xe60] sm:$0xff] %v1114_v41  ;;  %1627 = vst [vmem:[%s2085_s21 + $0xe68] sm:$0xff] %v1115_v42  ;;  %v1144_v38 = vmul.f32 %v2064_v6, %v630_v35  ;;  %v1145_v39 = vmul.f32 %v2064_v6, %v631_v36  ;;  %v632_v40 = vld [vmem:[%s2052_s6 + $0xf60] sm:$0xff]  ;;  %v633_v41 = vld [vmem:[%s2052_s6 + $0xf68] sm:$0xff] }
 0x129   : > { %1628 = vst [vmem:[%s2085_s21 + $0xe70] sm:$0xff] %v1116_v46  ;;  %1629 = vst [vmem:[%s2085_s21 + $0xe78] sm:$0xff] %v1117_v47  ;;  %v634_v42 = vld [vmem:[%s2052_s6 + $0xf70] sm:$0xff]  ;;  %v1146_v43 = vmul.f32 %v2064_v6, %v632_v40  ;;  %v1147_v44 = vmul.f32 %v2064_v6, %v633_v41  ;;  %v635_v46 = vld [vmem:[%s2052_s6 + $0xf78] sm:$0xff] }
 0x12a   : > { %1630 = vst [vmem:[%s2085_s21 + $0xe80] sm:$0xff] %v1118_v48  ;;  %1631 = vst [vmem:[%s2085_s21 + $0xe88] sm:$0xff] %v1119_v52  ;;  %v1148_v45 = vmul.f32 %v2064_v6, %v634_v42  ;;  %v636_v47 = vld [vmem:[%s2052_s6 + $0xf80] sm:$0xff]  ;;  %v637_v48 = vld [vmem:[%s2052_s6 + $0xf88] sm:$0xff]  ;;  %v1149_v49 = vmul.f32 %v2064_v6, %v635_v46 }
 0x12b   : > { %1632 = vst [vmem:[%s2085_s21 + $0xe90] sm:$0xff] %v1120_v53  ;;  %1633 = vst [vmem:[%s2085_s21 + $0xe98] sm:$0xff] %v1121_v54  ;;  %v1150_v50 = vmul.f32 %v2064_v6, %v636_v47  ;;  %v1151_v51 = vmul.f32 %v2064_v6, %v637_v48  ;;  %v638_v52 = vld [vmem:[%s2052_s6 + $0xf90] sm:$0xff]  ;;  %v639_v53 = vld [vmem:[%s2052_s6 + $0xf98] sm:$0xff] }
 0x12c   : > { %1634 = vst [vmem:[%s2085_s21 + $0xea0] sm:$0xff] %v1122_v58  ;;  %1635 = vst [vmem:[%s2085_s21 + $0xea8] sm:$0xff] %v1123_v59  ;;  %v640_v54 = vld [vmem:[%s2052_s6 + $0xfa0] sm:$0xff]  ;;  %v1152_v55 = vmul.f32 %v2064_v6, %v638_v52  ;;  %v1153_v56 = vmul.f32 %v2064_v6, %v639_v53  ;;  %v641_v58 = vld [vmem:[%s2052_s6 + $0xfa8] sm:$0xff] }
 0x12d   : > { %1636 = vst [vmem:[%s2085_s21 + $0xeb0] sm:$0xff] %v1124_v60  ;;  %1637 = vst [vmem:[%s2085_s21 + $0xeb8] sm:$0xff] %v1125_v0  ;;  %v1154_v57 = vmul.f32 %v2064_v6, %v640_v54  ;;  %v642_v59 = vld [vmem:[%s2052_s6 + $0xfb0] sm:$0xff]  ;;  %v643_v60 = vld [vmem:[%s2052_s6 + $0xfb8] sm:$0xff]  ;;  %v1155_v61 = vmul.f32 %v2064_v6, %v641_v58 }
 0x12e   : > { %1638 = vst [vmem:[%s2085_s21 + $0xec0] sm:$0xff] %v1126_v1  ;;  %1639 = vst [vmem:[%s2085_s21 + $0xec8] sm:$0xff] %v1127_v2  ;;  %v1156_v62 = vmul.f32 %v2064_v6, %v642_v59  ;;  %v1157_v63 = vmul.f32 %v2064_v6, %v643_v60  ;;  %v644_v0 = vld [vmem:[%s2052_s6 + $0xfc0] sm:$0xff]  ;;  %v645_v1 = vld [vmem:[%s2052_s6 + $0xfc8] sm:$0xff] }
 0x12f   : > { %1640 = vst [vmem:[%s2085_s21 + $0xed0] sm:$0xff] %v1128_v7  ;;  %1641 = vst [vmem:[%s2085_s21 + $0xed8] sm:$0xff] %v1129_v8  ;;  %v646_v2 = vld [vmem:[%s2052_s6 + $0xfd0] sm:$0xff]  ;;  %v1158_v3 = vmul.f32 %v2064_v6, %v644_v0  ;;  %v1159_v4 = vmul.f32 %v2064_v6, %v645_v1  ;;  %v647_v7 = vld [vmem:[%s2052_s6 + $0xfd8] sm:$0xff] }
 0x130   : > { %1642 = vst [vmem:[%s2085_s21 + $0xee0] sm:$0xff] %v1130_v9  ;;  %1643 = vst [vmem:[%s2085_s21 + $0xee8] sm:$0xff] %v1131_v13  ;;  %v1160_v5 = vmul.f32 %v2064_v6, %v646_v2  ;;  %v648_v8 = vld [vmem:[%s2052_s6 + $0xfe0] sm:$0xff]  ;;  %v649_v9 = vld [vmem:[%s2052_s6 + $0xfe8] sm:$0xff]  ;;  %v1161_v10 = vmul.f32 %v2064_v6, %v647_v7 }
 0x131   : > { %1644 = vst [vmem:[%s2085_s21 + $0xef0] sm:$0xff] %v1132_v14  ;;  %1645 = vst [vmem:[%s2085_s21 + $0xef8] sm:$0xff] %v1133_v15  ;;  %v1162_v11 = vmul.f32 %v2064_v6, %v648_v8  ;;  %v1163_v12 = vmul.f32 %v2064_v6, %v649_v9  ;;  %v650_v13 = vld [vmem:[%s2052_s6 + $0xff0] sm:$0xff]  ;;  %v651_v14 = vld [vmem:[%s2052_s6 + $0xff8] sm:$0xff] }
 0x132   : > { %1646 = vst [vmem:[%s2085_s21 + $0xf00] sm:$0xff] %v1134_v19  ;;  %1647 = vst [vmem:[%s2085_s21 + $0xf08] sm:$0xff] %v1135_v20  ;;  %v1164_v15 = vmul.f32 %v2064_v6, %v650_v13  ;;  %v1165_v16 = vmul.f32 %v2064_v6, %v651_v14 }
 0x133   : > { %1648 = vst [vmem:[%s2085_s21 + $0xf10] sm:$0xff] %v1136_v21  ;;  %1649 = vst [vmem:[%s2085_s21 + $0xf18] sm:$0xff] %v1137_v25 }
 0x134   : > { %1650 = vst [vmem:[%s2085_s21 + $0xf20] sm:$0xff] %v1138_v26  ;;  %1651 = vst [vmem:[%s2085_s21 + $0xf28] sm:$0xff] %v1139_v27 }
 0x135   : > { %1652 = vst [vmem:[%s2085_s21 + $0xf30] sm:$0xff] %v1140_v31  ;;  %1653 = vst [vmem:[%s2085_s21 + $0xf38] sm:$0xff] %v1141_v32 }
 0x136   : > { %1654 = vst [vmem:[%s2085_s21 + $0xf40] sm:$0xff] %v1142_v33  ;;  %1655 = vst [vmem:[%s2085_s21 + $0xf48] sm:$0xff] %v1143_v37 }
 0x137   : > { %1656 = vst [vmem:[%s2085_s21 + $0xf50] sm:$0xff] %v1144_v38  ;;  %1657 = vst [vmem:[%s2085_s21 + $0xf58] sm:$0xff] %v1145_v39 }
 0x138   : > { %1658 = vst [vmem:[%s2085_s21 + $0xf60] sm:$0xff] %v1146_v43  ;;  %1659 = vst [vmem:[%s2085_s21 + $0xf68] sm:$0xff] %v1147_v44 }
 0x139   : > { %1660 = vst [vmem:[%s2085_s21 + $0xf70] sm:$0xff] %v1148_v45  ;;  %1661 = vst [vmem:[%s2085_s21 + $0xf78] sm:$0xff] %v1149_v49 }
 0x13a   : > { %1662 = vst [vmem:[%s2085_s21 + $0xf80] sm:$0xff] %v1150_v50  ;;  %1663 = vst [vmem:[%s2085_s21 + $0xf88] sm:$0xff] %v1151_v51 }
 0x13b   : > { %1664 = vst [vmem:[%s2085_s21 + $0xf90] sm:$0xff] %v1152_v55  ;;  %1665 = vst [vmem:[%s2085_s21 + $0xf98] sm:$0xff] %v1153_v56 }
 0x13c   : > { %1666 = vst [vmem:[%s2085_s21 + $0xfa0] sm:$0xff] %v1154_v57  ;;  %1667 = vst [vmem:[%s2085_s21 + $0xfa8] sm:$0xff] %v1155_v61 }
 0x13d   : > { %1668 = vst [vmem:[%s2085_s21 + $0xfb0] sm:$0xff] %v1156_v62  ;;  %1669 = vst [vmem:[%s2085_s21 + $0xfb8] sm:$0xff] %v1157_v63 }
 0x13e   : > { %1670 = vst [vmem:[%s2085_s21 + $0xfc0] sm:$0xff] %v1158_v3  ;;  %1671 = vst [vmem:[%s2085_s21 + $0xfc8] sm:$0xff] %v1159_v4 }
 0x13f   : > { %1672 = vst [vmem:[%s2085_s21 + $0xfd0] sm:$0xff] %v1160_v5  ;;  %1673 = vst [vmem:[%s2085_s21 + $0xfd8] sm:$0xff] %v1161_v10 }
 0x140   : > { %1674 = vst [vmem:[%s2085_s21 + $0xfe0] sm:$0xff] %v1162_v11  ;;  %1675 = vst [vmem:[%s2085_s21 + $0xfe8] sm:$0xff] %v1163_v12 }
 0x141   : > { %1676 = vst [vmem:[%s2085_s21 + $0xff0] sm:$0xff] %v1164_v15  ;;  %1677 = vst [vmem:[%s2085_s21 + $0xff8] sm:$0xff] %v1165_v16 }
 0x142   : > { %1872 = shalt.err (!%p1869_p10)
}
 0x143   : > { %s1873_s20 = scalar_lea.hbm %s3595_s8, 65536  ;;  %s1877_s26 = scalar_lea.hbm %s3652_s2, 131072 }
 0x144   : > { %p1874_p0 = scmp.ne.s32.totalorder %s3595_s8, %s1873_s20  ;;  %p1878_p1 = scmp.lt.s32.totalorder %s3595_s8, %s3652_s2 }
 0x145   : > { %p1879_p3 = scmp.lt.s32.totalorder %s1877_s26, %s1873_s20 }
 0x146   : > { %p1875_p2 = pnand %p1874_p0, %p3661_p12 }
 0x147   : > { %p1880_p6 = por %p1879_p3, %p1878_p1 }
 0x148   : > { %p1876_p9 = pneg %p1875_p2 }
 0x14a   : > { %p1881_p11 = pnand %p1880_p6, %p1876_p9 }
 0x14c   : > { %1884 = shalt.err (!%p1881_p11)
}
 0x14d   : > { %s1929_s6 = smov 128   ;;  %s1930_s29 = smov 8  }
 0x14e   : > { %1783 = dma.vmem_to_hbm [thread:$0]  (%p3661_p12), %s3597_s5, 65536, %s3595_s8, %s1679_s9, %s1929_s6, %s1929_s6, %s1930_s29  }
 0x14f PF: > { %s1707_s3 = sand.u32 1, %s1911_s11   ;;  %p3662_p13 = scmp.ne.s32.totalorder %s3658_s23, 0 }
 0x150   : > { %p3663_p4 = scmp.ge.s32.totalorder %s1923_s14, 2  ;;  %s1708_s21 = scalar_lea.sflag [#allocation6], %s1707_s3 }
 0x152   : > { %p1790_p5 = pnand %p3663_p4, %p3662_p13 }
 0x154   : > { %p1791_p7 = pneg %p1790_p5 }
 0x156   : > { %1906 = dma.done.wait (%p1791_p7), %s1708_s21, 65536  }
 0x157   : > { %1908 = vsyncadd (%p1791_p7), %s1708_s21, 4294901760  ;;  %p16_p8 = scmp.ge.s32.totalorder %s1974_s16, 4   ;;  %s3664_s11 = smov %s1915_s12 }
 0x158   : > { %s3665_s12 = smov %s1919_s13  ;;  %s3666_s13 = smov %s1986_s19 }
 0x159   : > { %s3667_s14 = smov %s1974_s16  ;;  %18 = sbr.rel (!%p16_p8) target bundleno = 7 (0x7), region = 69 }
 0x15e   :  { %1713 = vsyncpa [#allocation5], 1 }
 0x15f   :  { %1715 = vsyncpa [#allocation5 + $0x1], 1 }
 0x160   :  { %1716 = vsyncpa [#allocation6], 1 }
 0x161   :  { %1718 = vsyncpa [#allocation6 + $0x1], 1 }

</bundles_post_ra>
